<compile_context>
chip_gen: v6e
topology: v6e:2x2x1
jax: 0.10.0
libtpu: 0.0.40
codegen_flags: <defaults>
</compile_context>

<pallas_src>
from functools import partial

import numpy as np
import jax
import jax.numpy as jnp
from jax import lax
from jax.experimental import pallas as pl
from jax.experimental.pallas import tpu as pltpu

# ---------------- small synthetic configuration ----------------
B = 4                 # batch
CH = 32               # image channel dim (== img_dim: channel-mean feeds init_state)
HH = WW = 2           # spatial size of the image code
IMG_DIM = CH
CAP_DIM = 16
VOCAB = 50
HIDDEN = 32
NUM_LAYERS = 1
T = 8                 # max caption length

SUBLANE = 8
GPAD = 128            # 3*HIDDEN = 96 gate columns padded to one full 128-lane row
VPAD = 128            # VOCAB = 50 padded to 128 lanes (unmasked vst on output)


# ---------------- weight packing for the kernel (done once, tiny XLA glue) ----
def _stack_gates(w):
    # (3, in, H) per-gate (r, z, n)  ->  (in, GPAD) columns [r | z | n | 0-pad]
    s = jnp.concatenate([w[0], w[1], w[2]], axis=1)
    return jnp.pad(s, ((0, 0), (0, GPAD - s.shape[1])))


def prepare_kernel_params(p):
    return {
        "init_w": p["init_w"],
        "init_b": p["init_b"].reshape(1, -1),
        "ie_w":   p["img_embed_w"],
        "ie_b":   p["img_embed_b"].reshape(1, -1),
        "wi_img": _stack_gates(p["gru_wi_img"]),
        "wi_cap": _stack_gates(p["gru_wi_cap"]),
        "wh":     _stack_gates(p["gru_wh"]),
        "bi":     _stack_gates(p["gru_bi"]),
        "bh":     _stack_gates(p["gru_bh"]),
        "fc_w":   jnp.pad(p["fc_w"], ((0, 0), (0, VPAD - VOCAB))),
        "fc_b":   jnp.pad(p["fc_b"], ((0, 0), (0, VPAD - VOCAB))),
    }


# ---------------- the single fused GRU-decoder kernel -------------------------
def fused_gru_decode(mask, img_flat, img_mean, cap2d, kp, t_steps, b_pad):
    tb = t_steps * b_pad
    hdim = HIDDEN

    def kernel(mask_ref, img_flat_ref, img_mean_ref, cap_ref,
               init_w_ref, init_b_ref, ie_w_ref, ie_b_ref,
               wi_img_ref, wi_cap_ref, wh_ref, bi_ref, bh_ref,
               fc_w_ref, fc_b_ref,
               pred_ref, gi_scr, h_scr):
        f32 = jnp.float32

        # ---- one-shot embeddings (outside the serial recurrence) ------------
        # hidden_state = init_state(image_code.mean(1)), num_layers == 1
        h0 = jnp.dot(img_mean_ref[...], init_w_ref[...],
                     preferred_element_type=f32) + init_b_ref[...]
        # img_embeds = img_embed(image_code.reshape(B, -1))
        img_emb = jnp.dot(img_flat_ref[...], ie_w_ref[...],
                          preferred_element_type=f32) + ie_b_ref[...]

        # ---- hoisted input-side gate pre-activations -------------------------
        # time-invariant half: (B_pad, GPAD)
        gi_img = jnp.dot(img_emb, wi_img_ref[...], preferred_element_type=f32)
        # all steps at once: one (T*B_pad, CAP_DIM) @ (CAP_DIM, GPAD) matmul
        gi_scr[...] = jnp.dot(cap_ref[...], wi_cap_ref[...],
                              preferred_element_type=f32) + bi_ref[...]

        wh = wh_ref[...]           # (HIDDEN, GPAD), gates stacked along lanes
        bh = bh_ref[...]

        # ---- sequential GRU recurrence: unrolled, 1 MXU push per step --------
        def step(t, h):
            row = pl.multiple_of(t * b_pad, SUBLANE)
            gi = gi_scr[pl.ds(row, b_pad), :] + gi_img            # (B_pad, GPAD)
            gh = jnp.dot(h, wh, preferred_element_type=f32) + bh  # (B_pad, GPAD)
            r = jax.nn.sigmoid(gi[:, 0:hdim] + gh[:, 0:hdim])
            z = jax.nn.sigmoid(gi[:, hdim:2 * hdim] + gh[:, hdim:2 * hdim])
            n = jnp.tanh(gi[:, 2 * hdim:3 * hdim] + r * gh[:, 2 * hdim:3 * hdim])
            h_new = (1.0 - z) * n + z * h
            h_scr[pl.ds(row, b_pad), :] = h_new
            # rows outside PyTorch's shrinking real_batch_size keep a frozen h
            m = mask_ref[pl.ds(row, b_pad), :]                    # (B_pad, 1)
            return m * h_new + (1.0 - m) * h

        lax.fori_loop(0, t_steps, step, h0, unroll=True)

        # ---- batched output projection, outside the serial chain -------------
        # TODO(synk): nn.Dropout(p=0.5) before fc is identity (eval mode);
        # training-mode dropout RNG is not reproduced here.
        preds = jnp.dot(h_scr[...], fc_w_ref[...],
                        preferred_element_type=f32) + fc_b_ref[...]   # (T*B_pad, VPAD)
        pred_ref[...] = preds * mask_ref[...]        # ended rows emit zeros

    args = (mask, img_flat, img_mean, cap2d,
            kp["init_w"], kp["init_b"], kp["ie_w"], kp["ie_b"],
            kp["wi_img"], kp["wi_cap"], kp["wh"], kp["bi"], kp["bh"],
            kp["fc_w"], kp["fc_b"])
    full = lambda a: pl.BlockSpec(a.shape, lambda i: (0, 0))

    return pl.pallas_call(
        kernel,
        out_shape=jax.ShapeDtypeStruct((tb, VPAD), jnp.float32),
        grid=(1,),
        in_specs=[full(a) for a in args],
        out_specs=pl.BlockSpec((tb, VPAD), lambda i: (0, 0)),
        scratch_shapes=[pltpu.VMEM((tb, GPAD), jnp.float32),   # hoisted input gates
                        pltpu.VMEM((tb, HIDDEN), jnp.float32)],  # per-step hidden states
        compiler_params=pltpu.CompilerParams(
            dimension_semantics=("arbitrary",)),
    )(*args)


# ---------------- parameters (deterministic, in-script) -----------------------
def init_params(key):
    ks = jax.random.split(key, 11)
    u = lambda k, shape, a: jax.random.uniform(k, shape, jnp.float32, -a, a)
    s = 1.0 / np.sqrt(HIDDEN)
    p = {
        "cap_embed":   u(ks[0], (VOCAB, CAP_DIM), 0.1),                        # Embedding
        "img_embed_w": u(ks[1], (HH * WW * CH, IMG_DIM), 0.1),                 # Linear (x@W form)
        "img_embed_b": u(ks[2], (IMG_DIM,), 1.0 / np.sqrt(HH * WW * CH)),
        "init_w":      u(ks[3], (IMG_DIM, NUM_LAYERS * HIDDEN), 1.0 / np.sqrt(IMG_DIM)),
        "init_b":      u(ks[4], (NUM_LAYERS * HIDDEN,), 1.0 / np.sqrt(IMG_DIM)),
        "gru_wi_img":  u(ks[5], (3, IMG_DIM, HIDDEN), s),   # gates stacked (r, z, n)
        "gru_wi_cap":  u(ks[6], (3, CAP_DIM, HIDDEN), s),
        "gru_wh":      u(ks[7], (3, HIDDEN, HIDDEN), s),
        "gru_bi":      u(ks[8], (3, 1, HIDDEN), s),
        "gru_bh":      u(ks[9], (3, 1, HIDDEN), s),
        "fc_w":        u(ks[10], (HIDDEN, VOCAB), 0.1),
        "fc_b":        jnp.zeros((1, VOCAB), jnp.float32),
    }
    return p


# ---------------- device-side forward (jitted glue + one pallas_call) ---------
@partial(jax.jit, static_argnames=("t_steps",))
def _device_forward(params, image_code, captions_s, mask, *, t_steps):
    b = image_code.shape[0]
    b_pad = ((b + SUBLANE - 1) // SUBLANE) * SUBLANE
    pad = b_pad - b

    img_flat = image_code.reshape(b, -1)                          # (B, H*W*C)
    img_mean = jnp.mean(image_code, axis=1)                       # (B, C)
    cap_embeds = params["cap_embed"][captions_s[:, :t_steps]]     # (B, t, CAP_DIM) gather (glue)
    cap_tb = jnp.transpose(cap_embeds, (1, 0, 2))                 # (t, B, CAP_DIM)

    img_flat_p = jnp.pad(img_flat, ((0, pad), (0, 0)))
    img_mean_p = jnp.pad(img_mean, ((0, pad), (0, 0)))
    cap_p = jnp.pad(cap_tb, ((0, 0), (0, pad), (0, 0))).reshape(t_steps * b_pad, CAP_DIM)

    kp = prepare_kernel_params(params)
    out2d = fused_gru_decode(mask, img_flat_p, img_mean_p, cap_p, kp, t_steps, b_pad)

    preds = out2d.reshape(t_steps, b_pad, VPAD)[:, :b, :VOCAB]
    return jnp.transpose(preds, (1, 0, 2))                        # (B, t_steps, VOCAB)


# ---------------- forward (mirrors GRUDecoder.forward) ------------------------
def gru_decoder_forward(params, img, captions, cap_lens):
    b, c, hh, ww = img.shape
    cap_lens_np = np.asarray(cap_lens)

    # sort by caption length, descending -- all on the HOST (no mid-forward sync).
    # assumes distinct lengths (with ties the row order may differ from PyTorch's
    # sort, though the per-row values are unchanged).
    order = np.argsort(-cap_lens_np, kind="stable")
    sorted_cap_lens = cap_lens_np[order]
    lengths = sorted_cap_lens - 1
    t_steps = int(lengths[0])

    b_pad = ((b + SUBLANE - 1) // SUBLANE) * SUBLANE
    lengths_p = np.zeros((b_pad,), np.int64)
    lengths_p[:b] = lengths
    # (step, row) mask = 1.0 while that caption is still active (real_batch_size)
    mask_np = (lengths_p[None, :] > np.arange(t_steps)[:, None]).astype(np.float32)
    mask = jnp.asarray(mask_np.reshape(t_steps * b_pad, 1))

    # NCHW -> (B, H*W, C) and row reorder (glue)
    image_code = jnp.transpose(img, (0, 2, 3, 1)).reshape(b, hh * ww, c)[order]
    captions_s = captions[order]

    predictions = _device_forward(params, image_code, captions_s, mask,
                                  t_steps=t_steps)
    return predictions, captions_s, lengths, order


# ---------------- pure numpy reference (PyTorch semantics) --------------------
def _sigmoid(x):
    return 1.0 / (1.0 + np.exp(-x))


def reference_forward(params, img, captions, cap_lens):
    p = {k: np.asarray(v, np.float32) for k, v in params.items()}
    img = np.asarray(img, np.float32)
    captions = np.asarray(captions)
    cap_lens = np.asarray(cap_lens)
    b, c, hh, ww = img.shape
    image_code = np.transpose(img, (0, 2, 3, 1)).reshape(b, hh * ww, c)
    order = np.argsort(-cap_lens, kind="stable")
    sorted_cap_lens = cap_lens[order]
    captions_s = captions[order]
    image_code = image_code[order]
    h = image_code.mean(axis=1) @ p["init_w"] + p["init_b"]
    lengths = sorted_cap_lens - 1
    t_steps = int(lengths[0])
    img_embeds = image_code.reshape(b, -1) @ p["img_embed_w"] + p["img_embed_b"]
    cap_embeds = p["cap_embed"][captions_s]
    preds = np.zeros((b, t_steps, VOCAB), np.float32)
    for step in range(t_steps):
        rb = int((lengths > step).sum())
        xi, xc, hcur = img_embeds[:rb], cap_embeds[:rb, step], h[:rb]
        gi = [xi @ p["gru_wi_img"][k] + xc @ p["gru_wi_cap"][k] + p["gru_bi"][k, 0]
              for k in range(3)]
        gh = [hcur @ p["gru_wh"][k] + p["gru_bh"][k, 0] for k in range(3)]
        r = _sigmoid(gi[0] + gh[0])
        z = _sigmoid(gi[1] + gh[1])
        n = np.tanh(gi[2] + r * gh[2])
        h_new = (1.0 - z) * n + z * hcur
        h = h.copy()
        h[:rb] = h_new
        preds[:rb, step] = h_new @ p["fc_w"] + p["fc_b"][0]
    return preds, captions_s, lengths, order


# ---------------- main ---------------------------------------------------------
if __name__ == "__main__":
    key = jax.random.PRNGKey(0)
    pkey, ikey, ckey = jax.random.split(key, 3)
    params = init_params(pkey)

    img = jax.random.uniform(ikey, (B, CH, HH, WW), jnp.float32, -1.0, 1.0)
    captions = jax.random.randint(ckey, (B, T), 0, VOCAB, dtype=jnp.int32)
    cap_lens = np.array([5, 7, 3, 6], np.int32)       # host-side lengths (distinct)

    preds, caps_s, lengths, order = gru_decoder_forward(params, img, captions, cap_lens)
    preds = jax.block_until_ready(preds)

    ref_preds = reference_forward(params, img, captions, cap_lens)[0]
    np.testing.assert_allclose(np.asarray(preds), ref_preds, rtol=2e-3, atol=2e-3)

    print("KERNEL_OK")
</pallas_src>

<mosaic_0001>
module attributes {stable_mosaic.version = 11 : i64} {
  func.func @kernel(%arg0: i32, %arg1: memref<48x1xf32, #tpu.memory_space<vmem>>, %arg2: memref<8x128xf32, #tpu.memory_space<vmem>>, %arg3: memref<8x32xf32, #tpu.memory_space<vmem>>, %arg4: memref<48x16xf32, #tpu.memory_space<vmem>>, %arg5: memref<32x32xf32, #tpu.memory_space<vmem>>, %arg6: memref<1x32xf32, #tpu.memory_space<vmem>>, %arg7: memref<128x32xf32, #tpu.memory_space<vmem>>, %arg8: memref<1x32xf32, #tpu.memory_space<vmem>>, %arg9: memref<32x128xf32, #tpu.memory_space<vmem>>, %arg10: memref<16x128xf32, #tpu.memory_space<vmem>>, %arg11: memref<32x128xf32, #tpu.memory_space<vmem>>, %arg12: memref<1x128xf32, #tpu.memory_space<vmem>>, %arg13: memref<1x128xf32, #tpu.memory_space<vmem>>, %arg14: memref<32x128xf32, #tpu.memory_space<vmem>>, %arg15: memref<1x128xf32, #tpu.memory_space<vmem>>, %arg16: memref<48x128xf32, #tpu.memory_space<vmem>>, %arg17: memref<48x128xf32, #tpu.memory_space<vmem>>, %arg18: memref<48x32xf32, #tpu.memory_space<vmem>>) attributes {dimension_semantics = [#tpu.dimension_semantics<arbitrary>], iteration_bounds = array<i64: 1>, scalar_prefetch = 0 : i64, scratch_operands = 2 : i64, tpu.core_type = #tpu.core_type<tc>, window_params = [{pipeline_mode = #tpu.pipeline_mode<synchronous>, transform_indices = @transform_0, window_bounds = array<i64: 48, 1>}, {pipeline_mode = #tpu.pipeline_mode<synchronous>, transform_indices = @transform_1, window_bounds = array<i64: 8, 128>}, {pipeline_mode = #tpu.pipeline_mode<synchronous>, transform_indices = @transform_2, window_bounds = array<i64: 8, 32>}, {pipeline_mode = #tpu.pipeline_mode<synchronous>, transform_indices = @transform_3, window_bounds = array<i64: 48, 16>}, {pipeline_mode = #tpu.pipeline_mode<synchronous>, transform_indices = @transform_4, window_bounds = array<i64: 32, 32>}, {pipeline_mode = #tpu.pipeline_mode<synchronous>, transform_indices = @transform_5, window_bounds = array<i64: 1, 32>}, {pipeline_mode = #tpu.pipeline_mode<synchronous>, transform_indices = @transform_6, window_bounds = array<i64: 128, 32>}, {pipeline_mode = #tpu.pipeline_mode<synchronous>, transform_indices = @transform_7, window_bounds = array<i64: 1, 32>}, {pipeline_mode = #tpu.pipeline_mode<synchronous>, transform_indices = @transform_8, window_bounds = array<i64: 32, 128>}, {pipeline_mode = #tpu.pipeline_mode<synchronous>, transform_indices = @transform_9, window_bounds = array<i64: 16, 128>}, {pipeline_mode = #tpu.pipeline_mode<synchronous>, transform_indices = @transform_10, window_bounds = array<i64: 32, 128>}, {pipeline_mode = #tpu.pipeline_mode<synchronous>, transform_indices = @transform_11, window_bounds = array<i64: 1, 128>}, {pipeline_mode = #tpu.pipeline_mode<synchronous>, transform_indices = @transform_12, window_bounds = array<i64: 1, 128>}, {pipeline_mode = #tpu.pipeline_mode<synchronous>, transform_indices = @transform_13, window_bounds = array<i64: 32, 128>}, {pipeline_mode = #tpu.pipeline_mode<synchronous>, transform_indices = @transform_14, window_bounds = array<i64: 1, 128>}, {pipeline_mode = #tpu.pipeline_mode<synchronous>, transform_indices = @transform_15, window_bounds = array<i64: 48, 128>}]} {
    %c0 = arith.constant 0 : index
    %c0_0 = arith.constant 0 : index
    %0 = vector.load %arg3[%c0, %c0_0] : memref<8x32xf32, #tpu.memory_space<vmem>>, vector<8x32xf32>
    %c0_1 = arith.constant 0 : index
    %c0_2 = arith.constant 0 : index
    %1 = vector.load %arg5[%c0_1, %c0_2] : memref<32x32xf32, #tpu.memory_space<vmem>>, vector<32x32xf32>
    %cst = arith.constant dense<0.000000e+00> : vector<8x32xf32>
    %2 = tpu.matmul %0, %1, %cst {dimension_numbers = #tpu.dot_dimension_numbers<[1], [0], [0], [1], [0, 0, 1, 1], [], []>} : vector<8x32xf32>, vector<32x32xf32>, vector<8x32xf32> -> vector<8x32xf32>
    %c0_3 = arith.constant 0 : index
    %c0_4 = arith.constant 0 : index
    %3 = vector.load %arg6[%c0_3, %c0_4] : memref<1x32xf32, #tpu.memory_space<vmem>>, vector<1x32xf32>
    %4 = vector.broadcast %3 : vector<1x32xf32> to vector<8x32xf32>
    %5 = arith.addf %2, %4 : vector<8x32xf32>
    %c0_5 = arith.constant 0 : index
    %c0_6 = arith.constant 0 : index
    %6 = vector.load %arg2[%c0_5, %c0_6] : memref<8x128xf32, #tpu.memory_space<vmem>>, vector<8x128xf32>
    %c0_7 = arith.constant 0 : index
    %c0_8 = arith.constant 0 : index
    %7 = vector.load %arg7[%c0_7, %c0_8] : memref<128x32xf32, #tpu.memory_space<vmem>>, vector<128x32xf32>
    %cst_9 = arith.constant dense<0.000000e+00> : vector<8x32xf32>
    %8 = tpu.matmul %6, %7, %cst_9 {dimension_numbers = #tpu.dot_dimension_numbers<[1], [0], [0], [1], [0, 0, 1, 1], [], []>} : vector<8x128xf32>, vector<128x32xf32>, vector<8x32xf32> -> vector<8x32xf32>
    %c0_10 = arith.constant 0 : index
    %c0_11 = arith.constant 0 : index
    %9 = vector.load %arg8[%c0_10, %c0_11] : memref<1x32xf32, #tpu.memory_space<vmem>>, vector<1x32xf32>
    %10 = vector.broadcast %9 : vector<1x32xf32> to vector<8x32xf32>
    %11 = arith.addf %8, %10 : vector<8x32xf32>
    %c0_12 = arith.constant 0 : index
    %c0_13 = arith.constant 0 : index
    %12 = vector.load %arg9[%c0_12, %c0_13] : memref<32x128xf32, #tpu.memory_space<vmem>>, vector<32x128xf32>
    %cst_14 = arith.constant dense<0.000000e+00> : vector<8x128xf32>
    %13 = tpu.matmul %11, %12, %cst_14 {dimension_numbers = #tpu.dot_dimension_numbers<[1], [0], [0], [1], [0, 0, 1, 1], [], []>} : vector<8x32xf32>, vector<32x128xf32>, vector<8x128xf32> -> vector<8x128xf32>
    %c0_15 = arith.constant 0 : index
    %c0_16 = arith.constant 0 : index
    %14 = vector.load %arg4[%c0_15, %c0_16] : memref<48x16xf32, #tpu.memory_space<vmem>>, vector<48x16xf32>
    %c0_17 = arith.constant 0 : index
    %c0_18 = arith.constant 0 : index
    %15 = vector.load %arg10[%c0_17, %c0_18] : memref<16x128xf32, #tpu.memory_space<vmem>>, vector<16x128xf32>
    %cst_19 = arith.constant dense<0.000000e+00> : vector<48x128xf32>
    %16 = tpu.matmul %14, %15, %cst_19 {dimension_numbers = #tpu.dot_dimension_numbers<[1], [0], [0], [1], [0, 0, 1, 1], [], []>} : vector<48x16xf32>, vector<16x128xf32>, vector<48x128xf32> -> vector<48x128xf32>
    %c0_20 = arith.constant 0 : index
    %c0_21 = arith.constant 0 : index
    %17 = vector.load %arg12[%c0_20, %c0_21] : memref<1x128xf32, #tpu.memory_space<vmem>>, vector<1x128xf32>
    %18 = vector.broadcast %17 : vector<1x128xf32> to vector<48x128xf32>
    %19 = arith.addf %16, %18 : vector<48x128xf32>
    %c0_22 = arith.constant 0 : index
    %c0_23 = arith.constant 0 : index
    %20 = vector.load %arg17[%c0_22, %c0_23] : memref<48x128xf32, #tpu.memory_space<vmem>>, vector<48x128xf32>
    tpu.vector_store %arg17[%c0_22, %c0_23], %19 {strides = array<i32>} : memref<48x128xf32, #tpu.memory_space<vmem>>, vector<48x128xf32>,
    %c0_24 = arith.constant 0 : index
    %c0_25 = arith.constant 0 : index
    %21 = vector.load %arg11[%c0_24, %c0_25] : memref<32x128xf32, #tpu.memory_space<vmem>>, vector<32x128xf32>
    %c0_26 = arith.constant 0 : index
    %c0_27 = arith.constant 0 : index
    %22 = vector.load %arg13[%c0_26, %c0_27] : memref<1x128xf32, #tpu.memory_space<vmem>>, vector<1x128xf32>
    %c0_i32 = arith.constant 0 : i32
    %c8_i32 = arith.constant 8 : i32
    %23 = arith.muli %c0_i32, %c8_i32 : i32
    %24 = tpu.assume_multiple %23, 8 : i32
    %25 = arith.index_cast %24 : i32 to index
    %c0_28 = arith.constant 0 : index
    %26 = vector.load %arg17[%25, %c0_28] : memref<48x128xf32, #tpu.memory_space<vmem>>, vector<8x128xf32>
    %27 = arith.addf %26, %13 : vector<8x128xf32>
    %cst_29 = arith.constant dense<0.000000e+00> : vector<8x128xf32>
    %28 = tpu.matmul %5, %21, %cst_29 {dimension_numbers = #tpu.dot_dimension_numbers<[1], [0], [0], [1], [0, 0, 1, 1], [], []>} : vector<8x32xf32>, vector<32x128xf32>, vector<8x128xf32> -> vector<8x128xf32>
    %29 = vector.broadcast %22 : vector<1x128xf32> to vector<8x128xf32>
    %30 = arith.addf %28, %29 : vector<8x128xf32>
    %31 = vector.extract_strided_slice %27 {offsets = [0, 0], sizes = [8, 32], strides = [1, 1]} : vector<8x128xf32> to vector<8x32xf32>
    %32 = vector.extract_strided_slice %30 {offsets = [0, 0], sizes = [8, 32], strides = [1, 1]} : vector<8x128xf32> to vector<8x32xf32>
    %33 = arith.addf %31, %32 : vector<8x32xf32>
    %34 = arith.negf %33 : vector<8x32xf32>
    %35 = math.exp %34 : vector<8x32xf32>
    %cst_30 = arith.constant 1.000000e+00 : f32
    %36 = vector.broadcast %cst_30 : f32 to vector<8x32xf32>
    %37 = arith.addf %36, %35 : vector<8x32xf32>
    %38 = arith.divf %36, %37 : vector<8x32xf32>
    %39 = vector.extract_strided_slice %27 {offsets = [0, 32], sizes = [8, 32], strides = [1, 1]} : vector<8x128xf32> to vector<8x32xf32>
    %40 = vector.extract_strided_slice %30 {offsets = [0, 32], sizes = [8, 32], strides = [1, 1]} : vector<8x128xf32> to vector<8x32xf32>
    %41 = arith.addf %39, %40 : vector<8x32xf32>
    %42 = arith.negf %41 : vector<8x32xf32>
    %43 = math.exp %42 : vector<8x32xf32>
    %cst_31 = arith.constant 1.000000e+00 : f32
    %44 = vector.broadcast %cst_31 : f32 to vector<8x32xf32>
    %45 = arith.addf %44, %43 : vector<8x32xf32>
    %46 = arith.divf %44, %45 : vector<8x32xf32>
    %47 = vector.extract_strided_slice %27 {offsets = [0, 64], sizes = [8, 32], strides = [1, 1]} : vector<8x128xf32> to vector<8x32xf32>
    %48 = vector.extract_strided_slice %30 {offsets = [0, 64], sizes = [8, 32], strides = [1, 1]} : vector<8x128xf32> to vector<8x32xf32>
    %49 = arith.mulf %38, %48 : vector<8x32xf32>
    %50 = arith.addf %47, %49 : vector<8x32xf32>
    %51 = math.tanh %50 : vector<8x32xf32>
    %cst_32 = arith.constant 1.000000e+00 : f32
    %52 = vector.broadcast %cst_32 : f32 to vector<8x32xf32>
    %53 = arith.subf %52, %46 : vector<8x32xf32>
    %54 = arith.mulf %53, %51 : vector<8x32xf32>
    %55 = arith.mulf %46, %5 : vector<8x32xf32>
    %56 = arith.addf %54, %55 : vector<8x32xf32>
    %57 = arith.index_cast %24 : i32 to index
    %c0_33 = arith.constant 0 : index
    %58 = vector.load %arg18[%57, %c0_33] : memref<48x32xf32, #tpu.memory_space<vmem>>, vector<8x32xf32>
    tpu.vector_store %arg18[%57, %c0_33], %56 {strides = array<i32>} : memref<48x32xf32, #tpu.memory_space<vmem>>, vector<8x32xf32>,
    %59 = arith.index_cast %24 : i32 to index
    %c0_34 = arith.constant 0 : index
    %60 = vector.load %arg1[%59, %c0_34] : memref<48x1xf32, #tpu.memory_space<vmem>>, vector<8x1xf32>
    %61 = vector.broadcast %60 : vector<8x1xf32> to vector<8x32xf32>
    %62 = arith.mulf %61, %56 : vector<8x32xf32>
    %cst_35 = arith.constant 1.000000e+00 : f32
    %63 = vector.broadcast %cst_35 : f32 to vector<8x1xf32>
    %64 = arith.subf %63, %60 : vector<8x1xf32>
    %65 = vector.broadcast %64 : vector<8x1xf32> to vector<8x32xf32>
    %66 = arith.mulf %65, %5 : vector<8x32xf32>
    %67 = arith.addf %62, %66 : vector<8x32xf32>
    %c1_i32 = arith.constant 1 : i32
    %c8_i32_36 = arith.constant 8 : i32
    %68 = arith.muli %c1_i32, %c8_i32_36 : i32
    %69 = tpu.assume_multiple %68, 8 : i32
    %70 = arith.index_cast %69 : i32 to index
    %c0_37 = arith.constant 0 : index
    %71 = vector.load %arg17[%70, %c0_37] : memref<48x128xf32, #tpu.memory_space<vmem>>, vector<8x128xf32>
    %72 = arith.addf %71, %13 : vector<8x128xf32>
    %cst_38 = arith.constant dense<0.000000e+00> : vector<8x128xf32>
    %73 = tpu.matmul %67, %21, %cst_38 {dimension_numbers = #tpu.dot_dimension_numbers<[1], [0], [0], [1], [0, 0, 1, 1], [], []>} : vector<8x32xf32>, vector<32x128xf32>, vector<8x128xf32> -> vector<8x128xf32>
    %74 = vector.broadcast %22 : vector<1x128xf32> to vector<8x128xf32>
    %75 = arith.addf %73, %74 : vector<8x128xf32>
    %76 = vector.extract_strided_slice %72 {offsets = [0, 0], sizes = [8, 32], strides = [1, 1]} : vector<8x128xf32> to vector<8x32xf32>
    %77 = vector.extract_strided_slice %75 {offsets = [0, 0], sizes = [8, 32], strides = [1, 1]} : vector<8x128xf32> to vector<8x32xf32>
    %78 = arith.addf %76, %77 : vector<8x32xf32>
    %79 = arith.negf %78 : vector<8x32xf32>
    %80 = math.exp %79 : vector<8x32xf32>
    %cst_39 = arith.constant 1.000000e+00 : f32
    %81 = vector.broadcast %cst_39 : f32 to vector<8x32xf32>
    %82 = arith.addf %81, %80 : vector<8x32xf32>
    %83 = arith.divf %81, %82 : vector<8x32xf32>
    %84 = vector.extract_strided_slice %72 {offsets = [0, 32], sizes = [8, 32], strides = [1, 1]} : vector<8x128xf32> to vector<8x32xf32>
    %85 = vector.extract_strided_slice %75 {offsets = [0, 32], sizes = [8, 32], strides = [1, 1]} : vector<8x128xf32> to vector<8x32xf32>
    %86 = arith.addf %84, %85 : vector<8x32xf32>
    %87 = arith.negf %86 : vector<8x32xf32>
    %88 = math.exp %87 : vector<8x32xf32>
    %cst_40 = arith.constant 1.000000e+00 : f32
    %89 = vector.broadcast %cst_40 : f32 to vector<8x32xf32>
    %90 = arith.addf %89, %88 : vector<8x32xf32>
    %91 = arith.divf %89, %90 : vector<8x32xf32>
    %92 = vector.extract_strided_slice %72 {offsets = [0, 64], sizes = [8, 32], strides = [1, 1]} : vector<8x128xf32> to vector<8x32xf32>
    %93 = vector.extract_strided_slice %75 {offsets = [0, 64], sizes = [8, 32], strides = [1, 1]} : vector<8x128xf32> to vector<8x32xf32>
    %94 = arith.mulf %83, %93 : vector<8x32xf32>
    %95 = arith.addf %92, %94 : vector<8x32xf32>
    %96 = math.tanh %95 : vector<8x32xf32>
    %cst_41 = arith.constant 1.000000e+00 : f32
    %97 = vector.broadcast %cst_41 : f32 to vector<8x32xf32>
    %98 = arith.subf %97, %91 : vector<8x32xf32>
    %99 = arith.mulf %98, %96 : vector<8x32xf32>
    %100 = arith.mulf %91, %67 : vector<8x32xf32>
    %101 = arith.addf %99, %100 : vector<8x32xf32>
    %102 = arith.index_cast %69 : i32 to index
    %c0_42 = arith.constant 0 : index
    %103 = vector.load %arg18[%102, %c0_42] : memref<48x32xf32, #tpu.memory_space<vmem>>, vector<8x32xf32>
    tpu.vector_store %arg18[%102, %c0_42], %101 {strides = array<i32>} : memref<48x32xf32, #tpu.memory_space<vmem>>, vector<8x32xf32>,
    %104 = arith.index_cast %69 : i32 to index
    %c0_43 = arith.constant 0 : index
    %105 = vector.load %arg1[%104, %c0_43] : memref<48x1xf32, #tpu.memory_space<vmem>>, vector<8x1xf32>
    %106 = vector.broadcast %105 : vector<8x1xf32> to vector<8x32xf32>
    %107 = arith.mulf %106, %101 : vector<8x32xf32>
    %cst_44 = arith.constant 1.000000e+00 : f32
    %108 = vector.broadcast %cst_44 : f32 to vector<8x1xf32>
    %109 = arith.subf %108, %105 : vector<8x1xf32>
    %110 = vector.broadcast %109 : vector<8x1xf32> to vector<8x32xf32>
    %111 = arith.mulf %110, %67 : vector<8x32xf32>
    %112 = arith.addf %107, %111 : vector<8x32xf32>
    %c2_i32 = arith.constant 2 : i32
    %c8_i32_45 = arith.constant 8 : i32
    %113 = arith.muli %c2_i32, %c8_i32_45 : i32
    %114 = tpu.assume_multiple %113, 8 : i32
    %115 = arith.index_cast %114 : i32 to index
    %c0_46 = arith.constant 0 : index
    %116 = vector.load %arg17[%115, %c0_46] : memref<48x128xf32, #tpu.memory_space<vmem>>, vector<8x128xf32>
    %117 = arith.addf %116, %13 : vector<8x128xf32>
    %cst_47 = arith.constant dense<0.000000e+00> : vector<8x128xf32>
    %118 = tpu.matmul %112, %21, %cst_47 {dimension_numbers = #tpu.dot_dimension_numbers<[1], [0], [0], [1], [0, 0, 1, 1], [], []>} : vector<8x32xf32>, vector<32x128xf32>, vector<8x128xf32> -> vector<8x128xf32>
    %119 = vector.broadcast %22 : vector<1x128xf32> to vector<8x128xf32>
    %120 = arith.addf %118, %119 : vector<8x128xf32>
    %121 = vector.extract_strided_slice %117 {offsets = [0, 0], sizes = [8, 32], strides = [1, 1]} : vector<8x128xf32> to vector<8x32xf32>
    %122 = vector.extract_strided_slice %120 {offsets = [0, 0], sizes = [8, 32], strides = [1, 1]} : vector<8x128xf32> to vector<8x32xf32>
    %123 = arith.addf %121, %122 : vector<8x32xf32>
    %124 = arith.negf %123 : vector<8x32xf32>
    %125 = math.exp %124 : vector<8x32xf32>
    %cst_48 = arith.constant 1.000000e+00 : f32
    %126 = vector.broadcast %cst_48 : f32 to vector<8x32xf32>
    %127 = arith.addf %126, %125 : vector<8x32xf32>
    %128 = arith.divf %126, %127 : vector<8x32xf32>
    %129 = vector.extract_strided_slice %117 {offsets = [0, 32], sizes = [8, 32], strides = [1, 1]} : vector<8x128xf32> to vector<8x32xf32>
    %130 = vector.extract_strided_slice %120 {offsets = [0, 32], sizes = [8, 32], strides = [1, 1]} : vector<8x128xf32> to vector<8x32xf32>
    %131 = arith.addf %129, %130 : vector<8x32xf32>
    %132 = arith.negf %131 : vector<8x32xf32>
    %133 = math.exp %132 : vector<8x32xf32>
    %cst_49 = arith.constant 1.000000e+00 : f32
    %134 = vector.broadcast %cst_49 : f32 to vector<8x32xf32>
    %135 = arith.addf %134, %133 : vector<8x32xf32>
    %136 = arith.divf %134, %135 : vector<8x32xf32>
    %137 = vector.extract_strided_slice %117 {offsets = [0, 64], sizes = [8, 32], strides = [1, 1]} : vector<8x128xf32> to vector<8x32xf32>
    %138 = vector.extract_strided_slice %120 {offsets = [0, 64], sizes = [8, 32], strides = [1, 1]} : vector<8x128xf32> to vector<8x32xf32>
    %139 = arith.mulf %128, %138 : vector<8x32xf32>
    %140 = arith.addf %137, %139 : vector<8x32xf32>
    %141 = math.tanh %140 : vector<8x32xf32>
    %cst_50 = arith.constant 1.000000e+00 : f32
    %142 = vector.broadcast %cst_50 : f32 to vector<8x32xf32>
    %143 = arith.subf %142, %136 : vector<8x32xf32>
    %144 = arith.mulf %143, %141 : vector<8x32xf32>
    %145 = arith.mulf %136, %112 : vector<8x32xf32>
    %146 = arith.addf %144, %145 : vector<8x32xf32>
    %147 = arith.index_cast %114 : i32 to index
    %c0_51 = arith.constant 0 : index
    %148 = vector.load %arg18[%147, %c0_51] : memref<48x32xf32, #tpu.memory_space<vmem>>, vector<8x32xf32>
    tpu.vector_store %arg18[%147, %c0_51], %146 {strides = array<i32>} : memref<48x32xf32, #tpu.memory_space<vmem>>, vector<8x32xf32>,
    %149 = arith.index_cast %114 : i32 to index
    %c0_52 = arith.constant 0 : index
    %150 = vector.load %arg1[%149, %c0_52] : memref<48x1xf32, #tpu.memory_space<vmem>>, vector<8x1xf32>
    %151 = vector.broadcast %150 : vector<8x1xf32> to vector<8x32xf32>
    %152 = arith.mulf %151, %146 : vector<8x32xf32>
    %cst_53 = arith.constant 1.000000e+00 : f32
    %153 = vector.broadcast %cst_53 : f32 to vector<8x1xf32>
    %154 = arith.subf %153, %150 : vector<8x1xf32>
    %155 = vector.broadcast %154 : vector<8x1xf32> to vector<8x32xf32>
    %156 = arith.mulf %155, %112 : vector<8x32xf32>
    %157 = arith.addf %152, %156 : vector<8x32xf32>
    %c3_i32 = arith.constant 3 : i32
    %c8_i32_54 = arith.constant 8 : i32
    %158 = arith.muli %c3_i32, %c8_i32_54 : i32
    %159 = tpu.assume_multiple %158, 8 : i32
    %160 = arith.index_cast %159 : i32 to index
    %c0_55 = arith.constant 0 : index
    %161 = vector.load %arg17[%160, %c0_55] : memref<48x128xf32, #tpu.memory_space<vmem>>, vector<8x128xf32>
    %162 = arith.addf %161, %13 : vector<8x128xf32>
    %cst_56 = arith.constant dense<0.000000e+00> : vector<8x128xf32>
    %163 = tpu.matmul %157, %21, %cst_56 {dimension_numbers = #tpu.dot_dimension_numbers<[1], [0], [0], [1], [0, 0, 1, 1], [], []>} : vector<8x32xf32>, vector<32x128xf32>, vector<8x128xf32> -> vector<8x128xf32>
    %164 = vector.broadcast %22 : vector<1x128xf32> to vector<8x128xf32>
    %165 = arith.addf %163, %164 : vector<8x128xf32>
    %166 = vector.extract_strided_slice %162 {offsets = [0, 0], sizes = [8, 32], strides = [1, 1]} : vector<8x128xf32> to vector<8x32xf32>
    %167 = vector.extract_strided_slice %165 {offsets = [0, 0], sizes = [8, 32], strides = [1, 1]} : vector<8x128xf32> to vector<8x32xf32>
    %168 = arith.addf %166, %167 : vector<8x32xf32>
    %169 = arith.negf %168 : vector<8x32xf32>
    %170 = math.exp %169 : vector<8x32xf32>
    %cst_57 = arith.constant 1.000000e+00 : f32
    %171 = vector.broadcast %cst_57 : f32 to vector<8x32xf32>
    %172 = arith.addf %171, %170 : vector<8x32xf32>
    %173 = arith.divf %171, %172 : vector<8x32xf32>
    %174 = vector.extract_strided_slice %162 {offsets = [0, 32], sizes = [8, 32], strides = [1, 1]} : vector<8x128xf32> to vector<8x32xf32>
    %175 = vector.extract_strided_slice %165 {offsets = [0, 32], sizes = [8, 32], strides = [1, 1]} : vector<8x128xf32> to vector<8x32xf32>
    %176 = arith.addf %174, %175 : vector<8x32xf32>
    %177 = arith.negf %176 : vector<8x32xf32>
    %178 = math.exp %177 : vector<8x32xf32>
    %cst_58 = arith.constant 1.000000e+00 : f32
    %179 = vector.broadcast %cst_58 : f32 to vector<8x32xf32>
    %180 = arith.addf %179, %178 : vector<8x32xf32>
    %181 = arith.divf %179, %180 : vector<8x32xf32>
    %182 = vector.extract_strided_slice %162 {offsets = [0, 64], sizes = [8, 32], strides = [1, 1]} : vector<8x128xf32> to vector<8x32xf32>
    %183 = vector.extract_strided_slice %165 {offsets = [0, 64], sizes = [8, 32], strides = [1, 1]} : vector<8x128xf32> to vector<8x32xf32>
    %184 = arith.mulf %173, %183 : vector<8x32xf32>
    %185 = arith.addf %182, %184 : vector<8x32xf32>
    %186 = math.tanh %185 : vector<8x32xf32>
    %cst_59 = arith.constant 1.000000e+00 : f32
    %187 = vector.broadcast %cst_59 : f32 to vector<8x32xf32>
    %188 = arith.subf %187, %181 : vector<8x32xf32>
    %189 = arith.mulf %188, %186 : vector<8x32xf32>
    %190 = arith.mulf %181, %157 : vector<8x32xf32>
    %191 = arith.addf %189, %190 : vector<8x32xf32>
    %192 = arith.index_cast %159 : i32 to index
    %c0_60 = arith.constant 0 : index
    %193 = vector.load %arg18[%192, %c0_60] : memref<48x32xf32, #tpu.memory_space<vmem>>, vector<8x32xf32>
    tpu.vector_store %arg18[%192, %c0_60], %191 {strides = array<i32>} : memref<48x32xf32, #tpu.memory_space<vmem>>, vector<8x32xf32>,
    %194 = arith.index_cast %159 : i32 to index
    %c0_61 = arith.constant 0 : index
    %195 = vector.load %arg1[%194, %c0_61] : memref<48x1xf32, #tpu.memory_space<vmem>>, vector<8x1xf32>
    %196 = vector.broadcast %195 : vector<8x1xf32> to vector<8x32xf32>
    %197 = arith.mulf %196, %191 : vector<8x32xf32>
    %cst_62 = arith.constant 1.000000e+00 : f32
    %198 = vector.broadcast %cst_62 : f32 to vector<8x1xf32>
    %199 = arith.subf %198, %195 : vector<8x1xf32>
    %200 = vector.broadcast %199 : vector<8x1xf32> to vector<8x32xf32>
    %201 = arith.mulf %200, %157 : vector<8x32xf32>
    %202 = arith.addf %197, %201 : vector<8x32xf32>
    %c4_i32 = arith.constant 4 : i32
    %c8_i32_63 = arith.constant 8 : i32
    %203 = arith.muli %c4_i32, %c8_i32_63 : i32
    %204 = tpu.assume_multiple %203, 8 : i32
    %205 = arith.index_cast %204 : i32 to index
    %c0_64 = arith.constant 0 : index
    %206 = vector.load %arg17[%205, %c0_64] : memref<48x128xf32, #tpu.memory_space<vmem>>, vector<8x128xf32>
    %207 = arith.addf %206, %13 : vector<8x128xf32>
    %cst_65 = arith.constant dense<0.000000e+00> : vector<8x128xf32>
    %208 = tpu.matmul %202, %21, %cst_65 {dimension_numbers = #tpu.dot_dimension_numbers<[1], [0], [0], [1], [0, 0, 1, 1], [], []>} : vector<8x32xf32>, vector<32x128xf32>, vector<8x128xf32> -> vector<8x128xf32>
    %209 = vector.broadcast %22 : vector<1x128xf32> to vector<8x128xf32>
    %210 = arith.addf %208, %209 : vector<8x128xf32>
    %211 = vector.extract_strided_slice %207 {offsets = [0, 0], sizes = [8, 32], strides = [1, 1]} : vector<8x128xf32> to vector<8x32xf32>
    %212 = vector.extract_strided_slice %210 {offsets = [0, 0], sizes = [8, 32], strides = [1, 1]} : vector<8x128xf32> to vector<8x32xf32>
    %213 = arith.addf %211, %212 : vector<8x32xf32>
    %214 = arith.negf %213 : vector<8x32xf32>
    %215 = math.exp %214 : vector<8x32xf32>
    %cst_66 = arith.constant 1.000000e+00 : f32
    %216 = vector.broadcast %cst_66 : f32 to vector<8x32xf32>
    %217 = arith.addf %216, %215 : vector<8x32xf32>
    %218 = arith.divf %216, %217 : vector<8x32xf32>
    %219 = vector.extract_strided_slice %207 {offsets = [0, 32], sizes = [8, 32], strides = [1, 1]} : vector<8x128xf32> to vector<8x32xf32>
    %220 = vector.extract_strided_slice %210 {offsets = [0, 32], sizes = [8, 32], strides = [1, 1]} : vector<8x128xf32> to vector<8x32xf32>
    %221 = arith.addf %219, %220 : vector<8x32xf32>
    %222 = arith.negf %221 : vector<8x32xf32>
    %223 = math.exp %222 : vector<8x32xf32>
    %cst_67 = arith.constant 1.000000e+00 : f32
    %224 = vector.broadcast %cst_67 : f32 to vector<8x32xf32>
    %225 = arith.addf %224, %223 : vector<8x32xf32>
    %226 = arith.divf %224, %225 : vector<8x32xf32>
    %227 = vector.extract_strided_slice %207 {offsets = [0, 64], sizes = [8, 32], strides = [1, 1]} : vector<8x128xf32> to vector<8x32xf32>
    %228 = vector.extract_strided_slice %210 {offsets = [0, 64], sizes = [8, 32], strides = [1, 1]} : vector<8x128xf32> to vector<8x32xf32>
    %229 = arith.mulf %218, %228 : vector<8x32xf32>
    %230 = arith.addf %227, %229 : vector<8x32xf32>
    %231 = math.tanh %230 : vector<8x32xf32>
    %cst_68 = arith.constant 1.000000e+00 : f32
    %232 = vector.broadcast %cst_68 : f32 to vector<8x32xf32>
    %233 = arith.subf %232, %226 : vector<8x32xf32>
    %234 = arith.mulf %233, %231 : vector<8x32xf32>
    %235 = arith.mulf %226, %202 : vector<8x32xf32>
    %236 = arith.addf %234, %235 : vector<8x32xf32>
    %237 = arith.index_cast %204 : i32 to index
    %c0_69 = arith.constant 0 : index
    %238 = vector.load %arg18[%237, %c0_69] : memref<48x32xf32, #tpu.memory_space<vmem>>, vector<8x32xf32>
    tpu.vector_store %arg18[%237, %c0_69], %236 {strides = array<i32>} : memref<48x32xf32, #tpu.memory_space<vmem>>, vector<8x32xf32>,
    %239 = arith.index_cast %204 : i32 to index
    %c0_70 = arith.constant 0 : index
    %240 = vector.load %arg1[%239, %c0_70] : memref<48x1xf32, #tpu.memory_space<vmem>>, vector<8x1xf32>
    %241 = vector.broadcast %240 : vector<8x1xf32> to vector<8x32xf32>
    %242 = arith.mulf %241, %236 : vector<8x32xf32>
    %cst_71 = arith.constant 1.000000e+00 : f32
    %243 = vector.broadcast %cst_71 : f32 to vector<8x1xf32>
    %244 = arith.subf %243, %240 : vector<8x1xf32>
    %245 = vector.broadcast %244 : vector<8x1xf32> to vector<8x32xf32>
    %246 = arith.mulf %245, %202 : vector<8x32xf32>
    %247 = arith.addf %242, %246 : vector<8x32xf32>
    %c5_i32 = arith.constant 5 : i32
    %c8_i32_72 = arith.constant 8 : i32
    %248 = arith.muli %c5_i32, %c8_i32_72 : i32
    %249 = tpu.assume_multiple %248, 8 : i32
    %250 = arith.index_cast %249 : i32 to index
    %c0_73 = arith.constant 0 : index
    %251 = vector.load %arg17[%250, %c0_73] : memref<48x128xf32, #tpu.memory_space<vmem>>, vector<8x128xf32>
    %252 = arith.addf %251, %13 : vector<8x128xf32>
    %cst_74 = arith.constant dense<0.000000e+00> : vector<8x128xf32>
    %253 = tpu.matmul %247, %21, %cst_74 {dimension_numbers = #tpu.dot_dimension_numbers<[1], [0], [0], [1], [0, 0, 1, 1], [], []>} : vector<8x32xf32>, vector<32x128xf32>, vector<8x128xf32> -> vector<8x128xf32>
    %254 = vector.broadcast %22 : vector<1x128xf32> to vector<8x128xf32>
    %255 = arith.addf %253, %254 : vector<8x128xf32>
    %256 = vector.extract_strided_slice %252 {offsets = [0, 0], sizes = [8, 32], strides = [1, 1]} : vector<8x128xf32> to vector<8x32xf32>
    %257 = vector.extract_strided_slice %255 {offsets = [0, 0], sizes = [8, 32], strides = [1, 1]} : vector<8x128xf32> to vector<8x32xf32>
    %258 = arith.addf %256, %257 : vector<8x32xf32>
    %259 = arith.negf %258 : vector<8x32xf32>
    %260 = math.exp %259 : vector<8x32xf32>
    %cst_75 = arith.constant 1.000000e+00 : f32
    %261 = vector.broadcast %cst_75 : f32 to vector<8x32xf32>
    %262 = arith.addf %261, %260 : vector<8x32xf32>
    %263 = arith.divf %261, %262 : vector<8x32xf32>
    %264 = vector.extract_strided_slice %252 {offsets = [0, 32], sizes = [8, 32], strides = [1, 1]} : vector<8x128xf32> to vector<8x32xf32>
    %265 = vector.extract_strided_slice %255 {offsets = [0, 32], sizes = [8, 32], strides = [1, 1]} : vector<8x128xf32> to vector<8x32xf32>
    %266 = arith.addf %264, %265 : vector<8x32xf32>
    %267 = arith.negf %266 : vector<8x32xf32>
    %268 = math.exp %267 : vector<8x32xf32>
    %cst_76 = arith.constant 1.000000e+00 : f32
    %269 = vector.broadcast %cst_76 : f32 to vector<8x32xf32>
    %270 = arith.addf %269, %268 : vector<8x32xf32>
    %271 = arith.divf %269, %270 : vector<8x32xf32>
    %272 = vector.extract_strided_slice %252 {offsets = [0, 64], sizes = [8, 32], strides = [1, 1]} : vector<8x128xf32> to vector<8x32xf32>
    %273 = vector.extract_strided_slice %255 {offsets = [0, 64], sizes = [8, 32], strides = [1, 1]} : vector<8x128xf32> to vector<8x32xf32>
    %274 = arith.mulf %263, %273 : vector<8x32xf32>
    %275 = arith.addf %272, %274 : vector<8x32xf32>
    %276 = math.tanh %275 : vector<8x32xf32>
    %cst_77 = arith.constant 1.000000e+00 : f32
    %277 = vector.broadcast %cst_77 : f32 to vector<8x32xf32>
    %278 = arith.subf %277, %271 : vector<8x32xf32>
    %279 = arith.mulf %278, %276 : vector<8x32xf32>
    %280 = arith.mulf %271, %247 : vector<8x32xf32>
    %281 = arith.addf %279, %280 : vector<8x32xf32>
    %282 = arith.index_cast %249 : i32 to index
    %c0_78 = arith.constant 0 : index
    %283 = vector.load %arg18[%282, %c0_78] : memref<48x32xf32, #tpu.memory_space<vmem>>, vector<8x32xf32>
    tpu.vector_store %arg18[%282, %c0_78], %281 {strides = array<i32>} : memref<48x32xf32, #tpu.memory_space<vmem>>, vector<8x32xf32>,
    %284 = arith.index_cast %249 : i32 to index
    %c0_79 = arith.constant 0 : index
    %285 = vector.load %arg1[%284, %c0_79] : memref<48x1xf32, #tpu.memory_space<vmem>>, vector<8x1xf32>
    %286 = vector.broadcast %285 : vector<8x1xf32> to vector<8x32xf32>
    %287 = arith.mulf %286, %281 : vector<8x32xf32>
    %cst_80 = arith.constant 1.000000e+00 : f32
    %288 = vector.broadcast %cst_80 : f32 to vector<8x1xf32>
    %289 = arith.subf %288, %285 : vector<8x1xf32>
    %290 = vector.broadcast %289 : vector<8x1xf32> to vector<8x32xf32>
    %291 = arith.mulf %290, %247 : vector<8x32xf32>
    %292 = arith.addf %287, %291 : vector<8x32xf32>
    %c6_i32 = arith.constant 6 : i32
    %c0_81 = arith.constant 0 : index
    %c0_82 = arith.constant 0 : index
    %293 = vector.load %arg18[%c0_81, %c0_82] : memref<48x32xf32, #tpu.memory_space<vmem>>, vector<48x32xf32>
    %c0_83 = arith.constant 0 : index
    %c0_84 = arith.constant 0 : index
    %294 = vector.load %arg14[%c0_83, %c0_84] : memref<32x128xf32, #tpu.memory_space<vmem>>, vector<32x128xf32>
    %cst_85 = arith.constant dense<0.000000e+00> : vector<48x128xf32>
    %295 = tpu.matmul %293, %294, %cst_85 {dimension_numbers = #tpu.dot_dimension_numbers<[1], [0], [0], [1], [0, 0, 1, 1], [], []>} : vector<48x32xf32>, vector<32x128xf32>, vector<48x128xf32> -> vector<48x128xf32>
    %c0_86 = arith.constant 0 : index
    %c0_87 = arith.constant 0 : index
    %296 = vector.load %arg15[%c0_86, %c0_87] : memref<1x128xf32, #tpu.memory_space<vmem>>, vector<1x128xf32>
    %297 = vector.broadcast %296 : vector<1x128xf32> to vector<48x128xf32>
    %298 = arith.addf %295, %297 : vector<48x128xf32>
    %c0_88 = arith.constant 0 : index
    %c0_89 = arith.constant 0 : index
    %299 = vector.load %arg1[%c0_88, %c0_89] : memref<48x1xf32, #tpu.memory_space<vmem>>, vector<48x1xf32>
    %300 = vector.broadcast %299 : vector<48x1xf32> to vector<48x128xf32>
    %301 = arith.mulf %298, %300 : vector<48x128xf32>
    %c0_90 = arith.constant 0 : index
    %c0_91 = arith.constant 0 : index
    %302 = vector.load %arg16[%c0_90, %c0_91] : memref<48x128xf32, #tpu.memory_space<vmem>>, vector<48x128xf32>
    tpu.vector_store %arg16[%c0_90, %c0_91], %301 {strides = array<i32>} : memref<48x128xf32, #tpu.memory_space<vmem>>, vector<48x128xf32>,
    return
  }
  func.func @transform_0(%arg0: i32) -> (i32, i32) {
    %c0_i32 = arith.constant 0 : i32
    %c0_i32_0 = arith.constant 0 : i32
    %c0_i32_1 = arith.constant 0 : i32
    return %c0_i32, %c0_i32_0 : i32, i32
  }
  func.func @transform_1(%arg0: i32) -> (i32, i32) {
    %c0_i32 = arith.constant 0 : i32
    %c0_i32_0 = arith.constant 0 : i32
    %c0_i32_1 = arith.constant 0 : i32
    return %c0_i32, %c0_i32_0 : i32, i32
  }
  func.func @transform_2(%arg0: i32) -> (i32, i32) {
    %c0_i32 = arith.constant 0 : i32
    %c0_i32_0 = arith.constant 0 : i32
    %c0_i32_1 = arith.constant 0 : i32
    return %c0_i32, %c0_i32_0 : i32, i32
  }
  func.func @transform_3(%arg0: i32) -> (i32, i32) {
    %c0_i32 = arith.constant 0 : i32
    %c0_i32_0 = arith.constant 0 : i32
    %c0_i32_1 = arith.constant 0 : i32
    return %c0_i32, %c0_i32_0 : i32, i32
  }
  func.func @transform_4(%arg0: i32) -> (i32, i32) {
    %c0_i32 = arith.constant 0 : i32
    %c0_i32_0 = arith.constant 0 : i32
    %c0_i32_1 = arith.constant 0 : i32
    return %c0_i32, %c0_i32_0 : i32, i32
  }
  func.func @transform_5(%arg0: i32) -> (i32, i32) {
    %c0_i32 = arith.constant 0 : i32
    %c0_i32_0 = arith.constant 0 : i32
    %c0_i32_1 = arith.constant 0 : i32
    return %c0_i32, %c0_i32_0 : i32, i32
  }
  func.func @transform_6(%arg0: i32) -> (i32, i32) {
    %c0_i32 = arith.constant 0 : i32
    %c0_i32_0 = arith.constant 0 : i32
    %c0_i32_1 = arith.constant 0 : i32
    return %c0_i32, %c0_i32_0 : i32, i32
  }
  func.func @transform_7(%arg0: i32) -> (i32, i32) {
    %c0_i32 = arith.constant 0 : i32
    %c0_i32_0 = arith.constant 0 : i32
    %c0_i32_1 = arith.constant 0 : i32
    return %c0_i32, %c0_i32_0 : i32, i32
  }
  func.func @transform_8(%arg0: i32) -> (i32, i32) {
    %c0_i32 = arith.constant 0 : i32
    %c0_i32_0 = arith.constant 0 : i32
    %c0_i32_1 = arith.constant 0 : i32
    return %c0_i32, %c0_i32_0 : i32, i32
  }
  func.func @transform_9(%arg0: i32) -> (i32, i32) {
    %c0_i32 = arith.constant 0 : i32
    %c0_i32_0 = arith.constant 0 : i32
    %c0_i32_1 = arith.constant 0 : i32
    return %c0_i32, %c0_i32_0 : i32, i32
  }
  func.func @transform_10(%arg0: i32) -> (i32, i32) {
    %c0_i32 = arith.constant 0 : i32
    %c0_i32_0 = arith.constant 0 : i32
    %c0_i32_1 = arith.constant 0 : i32
    return %c0_i32, %c0_i32_0 : i32, i32
  }
  func.func @transform_11(%arg0: i32) -> (i32, i32) {
    %c0_i32 = arith.constant 0 : i32
    %c0_i32_0 = arith.constant 0 : i32
    %c0_i32_1 = arith.constant 0 : i32
    return %c0_i32, %c0_i32_0 : i32, i32
  }
  func.func @transform_12(%arg0: i32) -> (i32, i32) {
    %c0_i32 = arith.constant 0 : i32
    %c0_i32_0 = arith.constant 0 : i32
    %c0_i32_1 = arith.constant 0 : i32
    return %c0_i32, %c0_i32_0 : i32, i32
  }
  func.func @transform_13(%arg0: i32) -> (i32, i32) {
    %c0_i32 = arith.constant 0 : i32
    %c0_i32_0 = arith.constant 0 : i32
    %c0_i32_1 = arith.constant 0 : i32
    return %c0_i32, %c0_i32_0 : i32, i32
  }
  func.func @transform_14(%arg0: i32) -> (i32, i32) {
    %c0_i32 = arith.constant 0 : i32
    %c0_i32_0 = arith.constant 0 : i32
    %c0_i32_1 = arith.constant 0 : i32
    return %c0_i32, %c0_i32_0 : i32, i32
  }
  func.func @transform_15(%arg0: i32) -> (i32, i32) {
    %c0_i32 = arith.constant 0 : i32
    %c0_i32_0 = arith.constant 0 : i32
    %c0_i32_1 = arith.constant 0 : i32
    return %c0_i32, %c0_i32_0 : i32, i32
  }
}

</mosaic_0001>

<bundles_post_ra>
// kernel: _device_forward.1
= control target key start
LH: loop header
LB: loop body
LE: loop exit
PB: predicated region body
PF: predicated region fallthrough
CT: control target
= control target key end

     0   :  { %v1684_v0 = vmov 0.0   ;;  %vm1685_vm0 = vmmov 0   ;;  %v1686_v4 = vmov 0   ;;  %vm62_vm1 = vcmask 261120   ;;  %s1687_s16 = smov 32   ;;  %s1688_s27 = smov 64   ;;  %s2171_s6 = inlined_call_operand.vmem [shape: f32[128,32], index: 6, kind: input, shape index: {}]   ;;  %s2172_s4 = inlined_call_operand.vmem [shape: f32[32,32], index: 4, kind: input, shape index: {}]   ;;  %s2173_s0 = inlined_call_operand.vmem [shape: f32[48,1], index: 0, kind: input, shape index: {}]   ;;  %s2174_s2 = inlined_call_operand.vmem [shape: f32[8,32], index: 2, kind: input, shape index: {}]   ;;  %s2175_s8 = inlined_call_operand.vmem [shape: f32[32,128], index: 8, kind: input, shape index: {}]   ;;  %s2176_s1 = inlined_call_operand.vmem [shape: f32[8,128], index: 1, kind: input, shape index: {}]   ;;  %s2177_s9 = inlined_call_operand.vmem [shape: f32[16,128], index: 9, kind: input, shape index: {}]   ;;  %s2178_s10 = inlined_call_operand.vmem [shape: f32[32,128], index: 10, kind: input, shape index: {}]   ;;  %s2179_s5 = inlined_call_operand.vmem [shape: f32[1,32], index: 5, kind: input, shape index: {}]   ;;  %s2180_s7 = inlined_call_operand.vmem [shape: f32[1,32], index: 7, kind: input, shape index: {}]   ;;  %s2181_s3 = inlined_call_operand.vmem [shape: f32[48,16], index: 3, kind: input, shape index: {}]   ;;  %s2182_s11 = inlined_call_operand.vmem [shape: f32[1,128], index: 11, kind: input, shape index: {}]   ;;  %s2183_s12 = inlined_call_operand.vmem [shape: f32[1,128], index: 12, kind: input, shape index: {}]   ;;  %s2184_s13 = inlined_call_operand.vmem [shape: f32[32,128], index: 13, kind: input, shape index: {}]   ;;  %s2185_s14 = inlined_call_operand.vmem [shape: f32[1,128], index: 14, kind: input, shape index: {}]   ;;  %s2186_s15 = inlined_call_operand.vmem [shape: f32[48,128], index: 15, kind: output, shape index: {}]  }
   0x1   :  { %1498 = vmatprep.subr.mxu1 %v1684_v0  ;;  %v152_v1 = vld [vmem:[%s2171_s6 + $0x78] sm:$0xff]  ;;  %v151_v2 = vld [vmem:[%s2171_s6 + $0x70] sm:$0xff]  ;;  %1530 = vmatprep.mubr.msk.f32.mxu1 %vm1685_vm0, %v1684_v0  ;;  %v150_v3 = vld [vmem:[%s2171_s6 + $0x68] sm:$0xff]  ;;  %vm322_vm2 = vcmask 130048  }
   0x2   :  { %1499 = vmatpush3.msra.mxu1 %v152_v1  ;;  %1487 = vmatprep.subr.mxu0 %v1684_v0  ;;  %v149_v5 = vld [vmem:[%s2171_s6 + $0x60] sm:$0xff]  ;;  %v54_v6 = vld [vmem:[%s2172_s4 + $0x18] sm:$0xff]  ;;  %v53_v8 = vld [vmem:[%s2172_s4 + $0x10] sm:$0xff] }
   0x3   :  { %1500 = vmatprep.subr.mxu1 %v1684_v0  ;;  %1495 = vmatprep.mubr.msk.f32.mxu0 %vm1685_vm0, %v1684_v0  ;;  %v148_v7 = vld [vmem:[%s2171_s6 + $0x58] sm:$0xff]  ;;  %v52_v9 = vld [vmem:[%s2172_s4 + $0x8] sm:$0xff]  ;;  %v1807_v10 = vld [vmem:[%s2173_s0] sm:$0xff] }
   0x4   :  { %1501 = vmatpush3.msra.mxu1 %v151_v2  ;;  %1646 = vset.pattern.permute.xlu1 %v1686_v4  ;;  %v147_v11 = vld [vmem:[%s2171_s6 + $0x50] sm:$0xff]  ;;  %v51_v12 = vld [vmem:[%s2172_s4] sm:$0xff]  ;;  %v146_v13 = vld [vmem:[%s2171_s6 + $0x48] sm:$0xff]  ;;  %v569_v15 = vsub.f32 1.0, %v1807_v10 }
   0x5   :  { %1502 = vmatprep.subr.mxu1 %v1684_v0  ;;  %1647 = vset.pattern.permute.xlu0 %v1686_v4  ;;  %v50_v14 = vld [vmem:[%s2174_s2] sm:$0xff]  ;;  %v233_v17 = vld [vmem:[%s2175_s8 + $0x18] sm:$0xff]  ;;  %v232_v19 = vld [vmem:[%s2175_s8 + $0x10] sm:$0xff] }
   0x6   :  { %1503 = vmatpush3.msra.mxu1 %v150_v3  ;;  %1488 = vmatpush3.msra.mxu0 %v54_v6  ;;  %v145_v16 = vld [vmem:[%s2171_s6 + $0x40] sm:$0xff]  ;;  %v144_v18 = vld [vmem:[%s2171_s6 + $0x38] sm:$0xff]  ;;  %v143_v20 = vld [vmem:[%s2171_s6 + $0x30] sm:$0xff] }
   0x7   :  { %1504 = vmatprep.subr.mxu1 %v1684_v0  ;;  %1489 = vmatprep.subr.mxu0 %v1684_v0  ;;  %v231_v21 = vld [vmem:[%s2175_s8 + $0x8] sm:$0xff]  ;;  %v141_v23 = vld [vmem:[%s2171_s6 + $0x20] sm:$0xff]  ;;  %v140_v24 = vld [vmem:[%s2171_s6 + $0x18] sm:$0xff] }
   0x8   :  { %1505 = vmatpush3.msra.mxu1 %v149_v5  ;;  %1490 = vmatpush3.msra.mxu0 %v53_v8  ;;  %v142_v22 = vld [vmem:[%s2171_s6 + $0x28] sm:$0xff]  ;;  %v139_v25 = vld [vmem:[%s2171_s6 + $0x10] sm:$0xff]  ;;  %v137_v27 = vld [vmem:[%s2171_s6] sm:$0xff] }
   0x9   :  { %1506 = vmatprep.subr.mxu1 %v1684_v0  ;;  %1491 = vmatprep.subr.mxu0 %v1684_v0  ;;  %v138_v26 = vld [vmem:[%s2171_s6 + $0x8] sm:$0xff]  ;;  %v136_v28 = vld [vmem:[%s2176_s1] sm:$0xff]  ;;  %v1895_v31 = vld [vmem:[%s2178_s10 + $0x18] sm:$0xff] }
   0xa   :  { %1507 = vmatpush3.msra.mxu1 %v148_v7  ;;  %1492 = vmatpush3.msra.mxu0 %v52_v9  ;;  %v230_v29 = vld [vmem:[%s2175_s8] sm:$0xff]  ;;  %v314_v30 = vld [vmem:[%s2177_s9 + $0x8] sm:$0xff]  ;;  %v1901_v32 = vld [vmem:[%s2178_s10 + $0x10] sm:$0xff] }
   0xb   :  { %1508 = vmatprep.subr.mxu1 %v1684_v0  ;;  %1493 = vmatprep.subr.mxu0 %v1684_v0  ;;  %v1908_v33 = vld [vmem:[%s2178_s10 + $0x8] sm:$0xff]  ;;  %v1916_v34 = vld [vmem:[%s2178_s10] sm:$0xff]  ;;  %v309_v46 = vld [vmem:[%s2181_s3 + $0x10] sm:$0xff] }
   0xc   :  { %1509 = vmatpush3.msra.mxu1 %v147_v11  ;;  %1494 = vmatpush3.msra.mxu0 %v51_v12  ;;  %v1377_v35 = vld [vmem:[%s2179_s5] ss:$0 sm:$0xff]  ;;  %v308_v45 = vld [vmem:[%s2181_s3 + $0x8] sm:$0xff]  ;;  %v310_v47 = vld [vmem:[%s2181_s3 + $0x18] sm:$0xff] }
   0xd   :  { %1510 = vmatprep.subr.mxu1 %v1684_v0  ;;  %1496 = vmatmul.mubr.msk.f32.vlgmr.msra.gmra.mxu0 %vm62_vm1, %v50_v14  ;;  %v1379_v39 = vld [vmem:[%s2180_s7] ss:$0 sm:$0xff]  ;;  %v312_v49 = vld [vmem:[%s2181_s3 + $0x28] sm:$0xff] }
   0xe   :  { %1511 = vmatpush3.msra.mxu1 %v146_v13  ;;  %572 = vperm.xlu1 %1646, %v569_v15   ;;  %v307_v42 = vld [vmem:[%s2181_s3] sm:$0xff] }
   0xf   :  { %1512 = vmatprep.subr.mxu1 %v1684_v0  ;;  %1533 = vmatprep.subr.mxu0 %v1684_v0  ;;  %v313_v44 = vld [vmem:[%s2177_s9] sm:$0xff] }
  0x10   :  { %1513 = vmatpush3.msra.mxu1 %v145_v16  ;;  %1534 = vmatpush3.msra.mxu0 %v233_v17  ;;  %v311_v48 = vld [vmem:[%s2181_s3 + $0x20] sm:$0xff] }
  0x11   :  { %1514 = vmatprep.subr.mxu1 %v1684_v0  ;;  %1535 = vmatprep.subr.mxu0 %v1684_v0  ;;  %v1381_v52 = vld [vmem:[%s2182_s11] ss:$0 sm:$0xff] }
  0x12   :  { %1515 = vmatpush3.msra.mxu1 %v144_v18  ;;  %1536 = vmatpush3.msra.mxu0 %v232_v19  ;;  %v1993_v5 = vld [vmem:[%s2183_s12] ss:$0 sm:$0xff]  ;;  %s1689_s12 = smov 96  }
  0x13   :  { %1516 = vmatprep.subr.mxu1 %v1684_v0  ;;  %1537 = vmatprep.subr.mxu0 %v1684_v0 }
  0x14   :  { %1517 = vmatpush3.msra.mxu1 %v143_v20  ;;  %1538 = vmatpush3.msra.mxu0 %v231_v21 }
  0x15   :  { %1518 = vmatprep.subr.mxu1 %v1684_v0  ;;  %1539 = vmatprep.subr.mxu0 %v1684_v0 }
  0x16   :  { %1519 = vmatpush3.msra.mxu1 %v142_v22  ;;  %1541 = vmatprep.mubr.msk.f32.mxu0 %vm1685_vm0, %v1684_v0 }
  0x17   :  { %1520 = vmatprep.subr.mxu1 %v1684_v0  ;;  %565 = vperm.xlu1 %1646, %v1807_v10  }
  0x18   :  { %1521 = vmatpush3.msra.mxu1 %v141_v23  ;;  %1540 = vmatpush3.msra.mxu0 %v230_v29 }
  0x19   :  { %1522 = vmatprep.subr.mxu1 %v1684_v0  ;;  %1544 = vmatprep.subr.mxu0 %v314_v30 }
  0x1a   :  { %1523 = vmatpush3.msra.mxu1 %v140_v24 }
  0x1b   :  { %1524 = vmatprep.subr.mxu1 %v1684_v0 }
  0x1c   :  { %1525 = vmatpush3.msra.mxu1 %v139_v25 }
  0x1d   :  { %1526 = vmatprep.subr.mxu1 %v1684_v0 }
  0x1e   :  { %1527 = vmatpush3.msra.mxu1 %v138_v26 }
  0x1f   :  { %1528 = vmatprep.subr.mxu1 %v1684_v0 }
  0x20   :  { %1529 = vmatpush3.msra.mxu1 %v137_v27 }
  0x21   :  { %1531 = vmatmul.mubr.f32.vlgmr.msra.gmra.mxu1 %v136_v28  ;;  %1579 = vmatprep.subr.mxu1 %v1684_v0 }
  0x22   :  { %1587 = vmatprep.mubr.msk.f32.mxu1 %vm1685_vm0, %v1684_v0  ;;  %1580 = vmatpush3.msra.mxu1 %v1895_v31 }
  0x23   :  { %1581 = vmatprep.subr.mxu1 %v1684_v0 }
  0x24   :  { %1582 = vmatpush3.msra.mxu1 %v1901_v32 }
  0x25   :  { %1583 = vmatprep.subr.mxu1 %v1684_v0 }
  0x26   :  { %1584 = vmatpush3.msra.mxu1 %v1908_v33 }
  0x27   :  { %1585 = vmatprep.subr.mxu1 %v1684_v0 }
  0x28   :  { %1586 = vmatpush3.msra.mxu1 %v1916_v34 }
  0x29   :  { %1601 = vmatprep.subr.mxu1 %v1684_v0 }
  0x89   :  { %v573_v23 = vpop.permute.xlu1 %572 }
  0x92   :  { %v566_v25 = vpop.permute.xlu1 %565 }
  0xcd   :  { %v132_v36 = vpop.f32.mrf.mxu0 }
  0xce   :  { %v1923_v37 = vadd.f32 %v1377_v35, %v132_v36 }
  0xcf   :  { %v1497_v38 = vpop.f32.mrf.mxu0 }
  0xd0   :  { %552 = vrot.lane.b32.xlu1 %v1923_v37, %s1687_s16  ;;  %v575_v24 = vmul.f32 %v573_v23, %v1923_v37 }
  0xe1   :  { %v226_v40 = vpop.f32.mrf.mxu1 }
  0xe2   :  { %v227_v41 = vadd.f32 %v1379_v39, %v226_v40 }
  0xe3   :  { %v1532_v43 = vpop.f32.mrf.mxu1 }
  0xe4   :  { %1542 = vmatmul.mubr.msk.f32.vlgmr.msra.gmra.mxu0 %vm62_vm1, %v227_v41  ;;  %v2025_v43 = vld [vmem:[%s2173_s0 + $0x8] sm:$0xff] }
  0xe5   :  { %1545 = vmatpush3.msra.mxu0 %v314_v30  ;;  %1548 = vmatprep.mubr.msk.f32.mxu0 %vm322_vm2, %v307_v42 }
  0xe6   :  { %1546 = vmatprep.subr.mxu0 %v313_v44 }
  0xe7   :  { %1547 = vmatpush3.msra.mxu0 %v313_v44 }
  0xe8   :  { %1557 = vmatprep.subr.mxu0 %v1684_v0  ;;  %1549 = vmatmul.mubr.msk.f32.vlgmr.msra.gmra.mxu0 %vm322_vm2, %v308_v45 }
  0xe9   :  { %1558 = vmatpush3.msra.mxu0 %v1895_v31  ;;  %1551 = vmatprep.mubr.msk.f32.mxu0 %vm322_vm2, %v309_v46 }
  0xea   :  { %1559 = vmatprep.subr.mxu0 %v1684_v0 }
  0xeb   :  { %1560 = vmatpush3.msra.mxu0 %v1901_v32 }
  0xec   :  { %1552 = vmatmul.mubr.msk.f32.gmra.mxu0 %vm322_vm2, %v310_v47  ;;  %1561 = vmatprep.subr.mxu0 %v1684_v0 }
  0xed   :  { %1562 = vmatpush3.msra.mxu0 %v1908_v33  ;;  %1554 = vmatprep.mubr.msk.f32.mxu0 %vm322_vm2, %v311_v48 }
  0xee   :  { %1563 = vmatprep.subr.mxu0 %v1684_v0 }
  0xef   :  { %1564 = vmatpush3.msra.mxu0 %v1916_v34 }
  0xf0   :  { %1555 = vmatmul.mubr.msk.f32.gmra.mxu0 %vm322_vm2, %v312_v49  ;;  %1568 = vmatprep.subr.mxu0 %v1684_v0 }
  0xf1   :  { %1565 = vmatprep.mubr.msk.f32.mxu0 %vm1685_vm0, %v1684_v0 }
  0xf4   :  { %1566 = vmatmul.mubr.msk.f32.vlgmr.msra.gmra.mxu0 %vm62_vm1, %v1923_v37 }
  0xf5   :  { %1569 = vmatpush3.msra.mxu0 %v1895_v31  ;;  %1576 = vmatprep.mubr.msk.f32.mxu0 %vm1685_vm0, %v1684_v0 }
  0xf6   :  { %1570 = vmatprep.subr.mxu0 %v1684_v0 }
  0xf7   :  { %1571 = vmatpush3.msra.mxu0 %v1901_v32 }
  0xf8   :  { %1572 = vmatprep.subr.mxu0 %v1684_v0 }
  0xf9   :  { %1573 = vmatpush3.msra.mxu0 %v1908_v33 }
  0xfa   :  { %1574 = vmatprep.subr.mxu0 %v1684_v0 }
  0xfb   :  { %1575 = vmatpush3.msra.mxu0 %v1916_v34 }
  0xfc   :  { %1590 = vmatprep.subr.mxu0 %v1684_v0 }
 0x142   :  { %v553_v27 = vpop.permute.xlu1 %552 }
 0x1a4   :  { %v303_v50 = vpop.f32.mrf.mxu0 }
 0x1a6   :  { %v1543_v51 = vpop.f32.mrf.mxu0 }
 0x1a7   :  { %v699_v51 = vsub.f32 1.0, %v2025_v43 }
 0x1a8   :  { %v1550_v53 = vpop.f32.mrf.mxu0 }
 0x1a9   :  { %v413_v54 = vadd.f32 %v1550_v53, %v1381_v52 }
 0x1aa   :  { %v407_v55 = vpop.f32.mrf.mxu0 }
 0x1ab   :  { %v1984_v56 = vadd.f32 %v413_v54, %v303_v50  ;;  %v408_v57 = vadd.f32 %v1381_v52, %v407_v55 }
 0x1ac   :  { %v1553_v58 = vpop.f32.mrf.mxu0 }
 0x1ad   :  { %v448_v59 = vadd.f32 %v408_v57, %v303_v50  ;;  %v423_v60 = vadd.f32 %v1553_v58, %v1381_v52 }
 0x1ae   :  { %v417_v61 = vpop.f32.mrf.mxu0 }
 0x1af   :  { %v1986_v62 = vadd.f32 %v423_v60, %v303_v50  ;;  %v418_v63 = vadd.f32 %v1381_v52, %v417_v61 }
 0x1b0   :  { %v1556_v1 = vpop.f32.mrf.mxu0 }
 0x1b1   :  { %v1988_v2 = vadd.f32 %v418_v63, %v303_v50  ;;  %v433_v3 = vadd.f32 %v1556_v1, %v1381_v52 }
 0x1b2   :  { %v427_v4 = vpop.f32.mrf.mxu0 }
 0x1b3   :  { %v1995_v6 = vadd.f32 %v433_v3, %v303_v50  ;;  %v428_v7 = vadd.f32 %v1381_v52, %v427_v4 }
 0x1b4   :  { %v524_v8 = vpop.f32.mrf.mxu0 }
 0x1b5   :  { %v1997_v9 = vadd.f32 %v428_v7, %v303_v50  ;;  %v525_v11 = vadd.f32 %v1993_v5, %v524_v8 }
 0x1b6   :  { %v1567_v12 = vpop.f32.mrf.mxu0 }
 0x1b7   :  { %536 = vrot.lane.b32.xlu0 %v525_v11, %s1688_s27  ;;  %v528_v13 = vadd.f32 %v525_v11, %v448_v59  ;;  %v2052_v12 = vld [vmem:[%s2173_s0 + $0x10] sm:$0xff] }
 0x1b9   :  { %v1390_v14 = vmul.f32 -1.442695, %v528_v13 }
 0x1bb   :  { %1648 = vpow2.f32 %v1390_v14 }
 0x1c8   :  { %v1649_v15 = vpop.eup %1648 }
 0x1c9   :  { %v532_v16 = vadd.f32 1.0, %v1649_v15 }
 0x1cb   :  { %1650 = vrcp.f32 %v532_v16 }
 0x1d8   :  { %v1651_v17 = vpop.eup %1650 }
 0x1d9   :  { %v546_v26 = vsub.f32 1.0, %v1651_v17  ;;  %v555_v30 = vmul.f32 %v1651_v17, %v553_v27 }
 0x229   :  { %v537_v18 = vpop.permute.xlu0 %536 }
 0x22a   :  { %v539_v19 = vmul.f32 %v1651_v17, %v537_v18 }
 0x22c   :  { %541 = vrot.lane.b32.xlu0 %v539_v19, %s1688_s27 }
 0x29e   :  { %v542_v20 = vpop.permute.xlu0 %541 }
 0x29f   :  { %v544_v21 = vadd.f32 %v542_v20, %v448_v59  ;;  %v825_v20 = vsub.f32 1.0, %v2052_v12 }
 0x2a1   :  { %1652 = vtanh.f32 %v544_v21 }
 0x2ae   :  { %v1653_v22 = vpop.eup %1652 }
 0x2af   :  { %548 = vrot.lane.b32.xlu0 %v1653_v22, %s1689_s12 }
 0x2b3   :  { %577 = vrot.lane.b32.xlu0 %v575_v24, %s1687_s16 }
 0x321   :  { %v549_v28 = vpop.permute.xlu0 %548 }
 0x322   :  { %v551_v29 = vmul.f32 %v549_v28, %v546_v26 }
 0x324   :  { %v2005_v35 = vadd.f32 %v555_v30, %v551_v29 }
 0x325   :  { %v578_v38 = vpop.permute.xlu0 %577 }
 0x326   :  { %v568_v36 = vmul.f32 %v566_v25, %v2005_v35 }
 0x328   :  { %v580_v39 = vadd.f32 %v578_v38, %v568_v36 }
 0x32a   :  { %585 = vrot.lane.b32.xlu1 %v580_v39, %s1689_s12 }
 0x39c   :  { %v586_v40 = vpop.permute.xlu1 %585 }
 0x39d   :  { %1577 = vmatmul.mubr.msk.f32.vlgmr.msra.gmra.mxu0 %vm62_vm1, %v586_v40 }
 0x39e   :  { %1591 = vmatpush3.msra.mxu0 %v1895_v31  ;;  %1598 = vmatprep.mubr.msk.f32.mxu0 %vm1685_vm0, %v1684_v0 }
 0x39f   :  { %1592 = vmatprep.subr.mxu0 %v1684_v0 }
 0x3a0   :  { %1593 = vmatpush3.msra.mxu0 %v1901_v32 }
 0x3a1   :  { %1594 = vmatprep.subr.mxu0 %v1684_v0 }
 0x3a2   :  { %1595 = vmatpush3.msra.mxu0 %v1908_v33 }
 0x3a3   :  { %1596 = vmatprep.subr.mxu0 %v1684_v0 }
 0x3a4   :  { %1597 = vmatpush3.msra.mxu0 %v1916_v34 }
 0x3a5   :  { %1612 = vmatprep.subr.mxu0 %v1684_v0 }
 0x45d   :  { %v655_v37 = vpop.f32.mrf.mxu0 }
 0x45e   :  { %v656_v41 = vadd.f32 %v1993_v5, %v655_v37 }
 0x45f   :  { %v1578_v42 = vpop.f32.mrf.mxu0 }
 0x460   :  { %667 = vrot.lane.b32.xlu0 %v656_v41, %s1688_s27  ;;  %v659_v44 = vadd.f32 %v656_v41, %v1984_v56 }
 0x462   :  { %v1392_v45 = vmul.f32 -1.442695, %v659_v44 }
 0x464   :  { %695 = vperm.xlu0 %1647, %v2025_v43   ;;  %1654 = vpow2.f32 %v1392_v45 }
 0x471   :  { %v1655_v46 = vpop.eup %1654 }
 0x472   :  { %v663_v47 = vadd.f32 1.0, %v1655_v46 }
 0x474   :  { %1656 = vrcp.f32 %v663_v47 }
 0x481   :  { %v1657_v48 = vpop.eup %1656 }
 0x482   :  { %v677_v57 = vsub.f32 1.0, %v1657_v48  ;;  %v683_v60 = vmul.f32 %v1657_v48, %v580_v39 }
 0x4d2   :  { %v668_v49 = vpop.permute.xlu0 %667 }
 0x4d3   :  { %v670_v50 = vmul.f32 %v1657_v48, %v668_v49 }
 0x4d5   :  { %672 = vrot.lane.b32.xlu1 %v670_v50, %s1688_s27 }
 0x4d9   :  { %702 = vperm.xlu1 %1646, %v699_v51  }
 0x4df   :  { %v696_v61 = vpop.permute.xlu0 %695 }
 0x547   :  { %v673_v52 = vpop.permute.xlu1 %672 }
 0x548   :  { %v675_v53 = vadd.f32 %v673_v52, %v1984_v56 }
 0x54a   :  { %1658 = vtanh.f32 %v675_v53 }
 0x554   :  { %v703_v55 = vpop.permute.xlu1 %702 }
 0x555   :  { %v705_v1 = vmul.f32 %v703_v55, %v580_v39 }
 0x557   :  { %v1659_v54 = vpop.eup %1658 }
 0x558   :  { %679 = vrot.lane.b32.xlu1 %v1659_v54, %s1689_s12 }
 0x5ca   :  { %v680_v58 = vpop.permute.xlu1 %679 }
 0x5cb   :  { %v682_v59 = vmul.f32 %v680_v58, %v677_v57 }
 0x5cd   :  { %v2033_v63 = vadd.f32 %v683_v60, %v682_v59 }
 0x5cf   :  { %v698_v3 = vmul.f32 %v696_v61, %v2033_v63 }
 0x5d1   :  { %v706_v4 = vadd.f32 %v705_v1, %v698_v3 }
 0x5d3   :  { %711 = vrot.lane.b32.xlu0 %v706_v4, %s1689_s12 }
 0x645   :  { %v712_v7 = vpop.permute.xlu0 %711 }
 0x646   :  { %1588 = vmatmul.mubr.msk.f32.vlgmr.msra.gmra.mxu1 %vm62_vm1, %v712_v7 }
 0x647   :  { %1602 = vmatpush3.msra.mxu1 %v1895_v31  ;;  %1609 = vmatprep.mubr.msk.f32.mxu1 %vm1685_vm0, %v1684_v0 }
 0x648   :  { %1603 = vmatprep.subr.mxu1 %v1684_v0 }
 0x649   :  { %1604 = vmatpush3.msra.mxu1 %v1901_v32 }
 0x64a   :  { %1605 = vmatprep.subr.mxu1 %v1684_v0 }
 0x64b   :  { %1606 = vmatpush3.msra.mxu1 %v1908_v33 }
 0x64c   :  { %1607 = vmatprep.subr.mxu1 %v1684_v0 }
 0x64d   :  { %1608 = vmatpush3.msra.mxu1 %v1916_v34 }
 0x706   :  { %v781_v56 = vpop.f32.mrf.mxu1 }
 0x707   :  { %v782_v8 = vadd.f32 %v1993_v5, %v781_v56 }
 0x708   :  { %v1589_v11 = vpop.f32.mrf.mxu1 }
 0x709   :  { %793 = vrot.lane.b32.xlu1 %v782_v8, %s1688_s27  ;;  %v785_v13 = vadd.f32 %v782_v8, %v1988_v2 }
 0x70b   :  { %v1395_v14 = vmul.f32 -1.442695, %v785_v13 }
 0x70d   :  { %821 = vperm.xlu1 %1646, %v2052_v12   ;;  %1660 = vpow2.f32 %v1395_v14 }
 0x71a   :  { %v1661_v15 = vpop.eup %1660 }
 0x71b   :  { %v789_v16 = vadd.f32 1.0, %v1661_v15 }
 0x71d   :  { %1662 = vrcp.f32 %v789_v16 }
 0x72a   :  { %v1663_v17 = vpop.eup %1662 }
 0x72b   :  { %v803_v25 = vsub.f32 1.0, %v1663_v17  ;;  %v809_v27 = vmul.f32 %v1663_v17, %v706_v4 }
 0x77b   :  { %v794_v18 = vpop.permute.xlu1 %793 }
 0x77c   :  { %v796_v19 = vmul.f32 %v1663_v17, %v794_v18 }
 0x77e   :  { %798 = vrot.lane.b32.xlu0 %v796_v19, %s1688_s27 }
 0x782   :  { %828 = vperm.xlu0 %1647, %v825_v20  }
 0x788   :  { %v822_v24 = vpop.permute.xlu1 %821 }
 0x7f0   :  { %v799_v21 = vpop.permute.xlu0 %798 }
 0x7f1   :  { %v801_v22 = vadd.f32 %v799_v21, %v1988_v2 }
 0x7f3   :  { %1664 = vtanh.f32 %v801_v22 }
 0x7fd   :  { %v829_v29 = vpop.permute.xlu0 %828 }
 0x7fe   :  { %v831_v36 = vmul.f32 %v829_v29, %v706_v4  ;;  %v1402_v4 = vld [vmem:[%s2173_s0 + $0x20] sm:$0xff] }
 0x7ff   :  { %v1077_v16 = vsub.f32 1.0, %v1402_v4 }
 0x800   :  { %v1665_v23 = vpop.eup %1664 }
 0x801   :  { %805 = vrot.lane.b32.xlu1 %v1665_v23, %s1689_s12 }
 0x873   :  { %v806_v26 = vpop.permute.xlu1 %805 }
 0x874   :  { %v808_v28 = vmul.f32 %v806_v26, %v803_v25 }
 0x876   :  { %v2060_v30 = vadd.f32 %v809_v27, %v808_v28 }
 0x878   :  { %v824_v38 = vmul.f32 %v822_v24, %v2060_v30 }
 0x87a   :  { %v832_v39 = vadd.f32 %v831_v36, %v824_v38 }
 0x87c   :  { %837 = vrot.lane.b32.xlu0 %v832_v39, %s1689_s12 }
 0x8ee   :  { %v838_v40 = vpop.permute.xlu0 %837 }
 0x8ef   :  { %1599 = vmatmul.mubr.msk.f32.vlgmr.msra.gmra.mxu0 %vm62_vm1, %v838_v40 }
 0x8f0   :  { %1613 = vmatpush3.msra.mxu0 %v1895_v31  ;;  %1620 = vmatprep.mubr.msk.f32.mxu0 %vm1685_vm0, %v1684_v0  ;;  %v2079_v31 = vld [vmem:[%s2173_s0 + $0x18] sm:$0xff] }
 0x8f1   :  { %1614 = vmatprep.subr.mxu0 %v1684_v0  ;;  %v951_v46 = vsub.f32 1.0, %v2079_v31 }
 0x8f2   :  { %1615 = vmatpush3.msra.mxu0 %v1901_v32 }
 0x8f3   :  { %1616 = vmatprep.subr.mxu0 %v1684_v0 }
 0x8f4   :  { %1617 = vmatpush3.msra.mxu0 %v1908_v33 }
 0x8f5   :  { %1618 = vmatprep.subr.mxu0 %v1684_v0 }
 0x8f6   :  { %1619 = vmatpush3.msra.mxu0 %v1916_v34 }
 0x9af   :  { %v907_v2 = vpop.f32.mrf.mxu0 }
 0x9b0   :  { %v908_v37 = vadd.f32 %v1993_v5, %v907_v2 }
 0x9b1   :  { %v1600_v41 = vpop.f32.mrf.mxu0 }
 0x9b2   :  { %919 = vrot.lane.b32.xlu1 %v908_v37, %s1688_s27  ;;  %v911_v32 = vadd.f32 %v908_v37, %v1986_v62 }
 0x9b4   :  { %v1398_v33 = vmul.f32 -1.442695, %v911_v32 }
 0x9b6   :  { %947 = vperm.xlu1 %1646, %v2079_v31   ;;  %1666 = vpow2.f32 %v1398_v33 }
 0x9c3   :  { %v1667_v0 = vpop.eup %1666 }
 0x9c4   :  { %v915_v42 = vadd.f32 1.0, %v1667_v0 }
 0x9c6   :  { %1668 = vrcp.f32 %v915_v42 }
 0x9d3   :  { %v1669_v34 = vpop.eup %1668 }
 0x9d4   :  { %v929_v51 = vsub.f32 1.0, %v1669_v34  ;;  %v935_v53 = vmul.f32 %v1669_v34, %v832_v39 }
 0xa24   :  { %v920_v44 = vpop.permute.xlu1 %919 }
 0xa25   :  { %v922_v45 = vmul.f32 %v1669_v34, %v920_v44 }
 0xa27   :  { %924 = vrot.lane.b32.xlu0 %v922_v45, %s1688_s27  ;;  %v1201_v45 = vld [vmem:[%s2184_s13] sm:$0xff] }
 0xa2b   :  { %954 = vperm.xlu0 %1647, %v951_v46  }
 0xa31   :  { %v948_v50 = vpop.permute.xlu1 %947 }
 0xa99   :  { %v925_v47 = vpop.permute.xlu0 %924 }
 0xa9a   :  { %v927_v48 = vadd.f32 %v925_v47, %v1986_v62 }
 0xa9c   :  { %1670 = vtanh.f32 %v927_v48 }
 0xaa6   :  { %v955_v55 = vpop.permute.xlu0 %954 }
 0xaa7   :  { %v957_v58 = vmul.f32 %v955_v55, %v832_v39  ;;  %v1330_v55 = vld [vmem:[%s2173_s0 + $0x28] sm:$0xff] }
 0xaa9   :  { %v1671_v49 = vpop.eup %1670 }
 0xaaa   :  { %931 = vrot.lane.b32.xlu1 %v1671_v49, %s1689_s12 }
 0xb1c   :  { %v932_v52 = vpop.permute.xlu1 %931 }
 0xb1d   :  { %v934_v54 = vmul.f32 %v932_v52, %v929_v51 }
 0xb1f   :  { %v2087_v57 = vadd.f32 %v935_v53, %v934_v54 }
 0xb21   :  { %v950_v59 = vmul.f32 %v948_v50, %v2087_v57 }
 0xb23   :  { %v958_v60 = vadd.f32 %v957_v58, %v950_v59  ;;  %v1405_v59 = vld [vmem:[%s2185_s14] ss:$0 sm:$0xff] }
 0xb25   :  { %963 = vrot.lane.b32.xlu0 %v958_v60, %s1689_s12 }
 0xb97   :  { %v964_v61 = vpop.permute.xlu0 %963 }
 0xb98   :  { %1610 = vmatmul.mubr.msk.f32.vlgmr.msra.gmra.mxu1 %vm62_vm1, %v964_v61 }
 0xc58   :  { %v1033_v62 = vpop.f32.mrf.mxu1 }
 0xc59   :  { %v1034_v1 = vadd.f32 %v1993_v5, %v1033_v62 }
 0xc5a   :  { %v1611_v3 = vpop.f32.mrf.mxu1 }
 0xc5b   :  { %1045 = vrot.lane.b32.xlu1 %v1034_v1, %s1688_s27  ;;  %v1037_v7 = vadd.f32 %v1034_v1, %v1997_v9 }
 0xc5d   :  { %v1401_v56 = vmul.f32 -1.442695, %v1037_v7 }
 0xc5f   :  { %1073 = vperm.xlu1 %1646, %v1402_v4   ;;  %1672 = vpow2.f32 %v1401_v56 }
 0xc6c   :  { %v1673_v8 = vpop.eup %1672 }
 0xc6d   :  { %v1041_v11 = vadd.f32 1.0, %v1673_v8 }
 0xc6f   :  { %1674 = vrcp.f32 %v1041_v11 }
 0xc7c   :  { %v1675_v13 = vpop.eup %1674 }
 0xc7d   :  { %v1055_v21 = vsub.f32 1.0, %v1675_v13  ;;  %v1061_v23 = vmul.f32 %v1675_v13, %v958_v60 }
 0xccd   :  { %v1046_v14 = vpop.permute.xlu1 %1045 }
 0xcce   :  { %v1048_v15 = vmul.f32 %v1675_v13, %v1046_v14 }
 0xcd0   :  { %1050 = vrot.lane.b32.xlu0 %v1048_v15, %s1688_s27 }
 0xcd4   :  { %1080 = vperm.xlu0 %1647, %v1077_v16  }
 0xcda   :  { %v1074_v20 = vpop.permute.xlu1 %1073 }
 0xd42   :  { %v1051_v17 = vpop.permute.xlu0 %1050 }
 0xd43   :  { %v1053_v18 = vadd.f32 %v1051_v17, %v1997_v9 }
 0xd45   :  { %1676 = vtanh.f32 %v1053_v18 }
 0xd4f   :  { %v1081_v25 = vpop.permute.xlu0 %1080 }
 0xd50   :  { %v1083_v27 = vmul.f32 %v1081_v25, %v958_v60 }
 0xd52   :  { %v1677_v19 = vpop.eup %1676 }
 0xd53   :  { %1057 = vrot.lane.b32.xlu1 %v1677_v19, %s1689_s12 }
 0xdc5   :  { %v1058_v22 = vpop.permute.xlu1 %1057 }
 0xdc6   :  { %v1060_v24 = vmul.f32 %v1058_v22, %v1055_v21 }
 0xdc8   :  { %v1062_v26 = vadd.f32 %v1061_v23, %v1060_v24 }
 0xdca   :  { %v1076_v28 = vmul.f32 %v1074_v20, %v1062_v26 }
 0xdcc   :  { %v1084_v29 = vadd.f32 %v1083_v27, %v1076_v28 }
 0xdce   :  { %1089 = vrot.lane.b32.xlu0 %v1084_v29, %s1689_s12 }
 0xe40   :  { %v1090_v36 = vpop.permute.xlu0 %1089 }
 0xe41   :  { %1621 = vmatmul.mubr.msk.f32.vlgmr.msra.gmra.mxu0 %vm62_vm1, %v1090_v36 }
 0xf01   :  { %v1159_v9 = vpop.f32.mrf.mxu0 }
 0xf02   :  { %v1160_v38 = vadd.f32 %v1993_v5, %v1159_v9 }
 0xf03   :  { %v1622_v39 = vpop.f32.mrf.mxu0 }
 0xf04   :  { %1171 = vrot.lane.b32.xlu1 %v1160_v38, %s1688_s27  ;;  %v1163_v40 = vadd.f32 %v1160_v38, %v1995_v6 }
 0xf06   :  { %v1404_v2 = vmul.f32 -1.442695, %v1163_v40 }
 0xf08   :  { %1678 = vpow2.f32 %v1404_v2 }
 0xf15   :  { %v1679_v37 = vpop.eup %1678 }
 0xf16   :  { %v1167_v41 = vadd.f32 1.0, %v1679_v37 }
 0xf18   :  { %1680 = vrcp.f32 %v1167_v41 }
 0xf25   :  { %v1681_v32 = vpop.eup %1680 }
 0xf26   :  { %v1181_v47 = vsub.f32 1.0, %v1681_v32  ;;  %v1187_v49 = vmul.f32 %v1681_v32, %v1084_v29 }
 0xf76   :  { %v1172_v33 = vpop.permute.xlu1 %1171 }
 0xf77   :  { %v1174_v0 = vmul.f32 %v1681_v32, %v1172_v33 }
 0xf79   :  { %1176 = vrot.lane.b32.xlu0 %v1174_v0, %s1688_s27 }
 0xf7d   :  { %558 = vrot.lane.b32.xlu0 %v2005_v35, %s1689_s12  ;;  %v1204_v35 = vld [vmem:[%s2184_s13 + $0x18] sm:$0xff] }
 0xf7e   :  { %1623 = vmatprep.subr.mxu1 %v1204_v35 }
 0xf7f   :  { %1624 = vmatpush3.msra.mxu1 %v1204_v35 }
 0xf81   :  { %812 = vrot.lane.b32.xlu0 %v2060_v30, %s1689_s12 }
 0xf85   :  { %1064 = vrot.lane.b32.xlu0 %v1062_v26, %s1689_s12 }
 0xf89   :  { %1333 = vperm.xlu0 %1647, %v1807_v10   ;;  %v1203_v10 = vld [vmem:[%s2184_s13 + $0x10] sm:$0xff] }
 0xf8a   :  { %1625 = vmatprep.subr.mxu1 %v1203_v10 }
 0xf8b   :  { %1626 = vmatpush3.msra.mxu1 %v1203_v10 }
 0xf8d   :  { %1343 = vperm.xlu0 %1647, %v2052_v12  }
 0xf91   :  { %1353 = vperm.xlu0 %1647, %v1402_v4  }
 0xfeb   :  { %v1177_v5 = vpop.permute.xlu0 %1176 }
 0xfec   :  { %v1179_v42 = vadd.f32 %v1177_v5, %v1995_v6  ;;  %v1202_v6 = vld [vmem:[%s2184_s13 + $0x8] sm:$0xff] }
 0xfed   :  { %1627 = vmatprep.subr.mxu1 %v1202_v6 }
 0xfee   :  { %1682 = vtanh.f32 %v1179_v42  ;;  %1628 = vmatpush3.msra.mxu1 %v1202_v6 }
 0xfef   :  { %v559_v34 = vpop.permute.xlu0 %558  ;;  %1629 = vmatprep.subr.mxu1 %v1201_v45 }
 0xff0   :  { %561 = vst.msk [vmem:[#allocation3] sm:$0xff] %vm62_vm1, %v559_v34  ;;  %1630 = vmatpush3.msra.mxu1 %v1201_v45 }
 0xff3   :  { %v813_v44 = vpop.permute.xlu0 %812 }
 0xff4   :  { %816 = vst.msk [vmem:[#allocation3 + $0x10] sm:$0xff] %vm62_vm1, %v813_v44 }
 0xff7   :  { %v1065_v12 = vpop.permute.xlu0 %1064  ;;  %v1195_v30 = vld [vmem:[#allocation3] sm:$0xff] }
 0xff8   :  { %1068 = vst.msk [vmem:[#allocation3 + $0x20] sm:$0xff] %vm62_vm1, %v1065_v12  ;;  %1631 = vmatprep.mubr.msk.f32.mxu1 %vm62_vm1, %v1195_v30 }
 0xffb   :  { %v1683_v46 = vpop.eup %1682 }
 0xffc   :  { %1183 = vrot.lane.b32.xlu1 %v1683_v46, %s1689_s12 }
 0xfff   :  { %v1199_v58 = vld [vmem:[#allocation3 + $0x20] sm:$0xff] }
0x1000   :  { %686 = vrot.lane.b32.xlu1 %v2033_v63, %s1689_s12  ;;  %v1197_v63 = vld [vmem:[#allocation3 + $0x10] sm:$0xff] }
0x1004   :  { %938 = vrot.lane.b32.xlu1 %v2087_v57, %s1689_s12  ;;  %v1334_v1 = vpop.permute.xlu0 %1333 }
0x1008   :  { %v1344_v17 = vpop.permute.xlu0 %1343 }
0x100c   :  { %v1354_v25 = vpop.permute.xlu0 %1353 }
0x106e   :  { %v1184_v48 = vpop.permute.xlu1 %1183 }
0x106f   :  { %v1186_v50 = vmul.f32 %v1184_v48, %v1181_v47 }
0x1071   :  { %v1188_v51 = vadd.f32 %v1187_v49, %v1186_v50 }
0x1072   :  { %v687_v52 = vpop.permute.xlu1 %686 }
0x1073   :  { %690 = vst.msk [vmem:[#allocation3 + $0x8] sm:$0xff] %vm62_vm1, %v687_v52  ;;  %1190 = vrot.lane.b32.xlu1 %v1188_v51, %s1689_s12 }
0x1076   :  { %v939_v53 = vpop.permute.xlu1 %938 }
0x1077   :  { %942 = vst.msk [vmem:[#allocation3 + $0x18] sm:$0xff] %vm62_vm1, %v939_v53  ;;  %1338 = vperm.xlu1 %1646, %v2025_v43  }
0x107a   :  { %v1196_v54 = vld [vmem:[#allocation3 + $0x8] sm:$0xff] }
0x107b   :  { %1348 = vperm.xlu1 %1646, %v2079_v31   ;;  %1632 = vmatmul.mubr.msk.f32.vlgmr.msra.gmra.mxu1 %vm62_vm1, %v1196_v54 }
0x107c   :  { %1634 = vmatprep.mubr.msk.f32.mxu1 %vm62_vm1, %v1197_v63 }
0x107e   :  { %v1198_v57 = vld [vmem:[#allocation3 + $0x18] sm:$0xff] }
0x107f   :  { %1358 = vperm.xlu1 %1646, %v1330_v55   ;;  %1635 = vmatmul.mubr.msk.f32.gmra.mxu1 %vm62_vm1, %v1198_v57 }
0x1080   :  { %1637 = vmatprep.mubr.msk.f32.mxu1 %vm62_vm1, %v1199_v58 }
0x10e5   :  { %v1191_v43 = vpop.permute.xlu1 %1190 }
0x10e6   :  { %1194 = vst.msk [vmem:[#allocation3 + $0x28] sm:$0xff] %vm62_vm1, %v1191_v43 }
0x10ed   :  { %v1200_v31 = vld [vmem:[#allocation3 + $0x28] sm:$0xff] }
0x10ee   :  { %1638 = vmatmul.mubr.msk.f32.gmra.mxu1 %vm62_vm1, %v1200_v31 }
0x10f2   :  { %v1339_v60 = vpop.permute.xlu1 %1338 }
0x10f6   :  { %v1349_v13 = vpop.permute.xlu1 %1348 }
0x10fa   :  { %v1359_v21 = vpop.permute.xlu1 %1358 }
0x113b   :  { %v1633_v61 = vpop.f32.mrf.mxu1 }
0x113c   :  { %v1302_v62 = vadd.f32 %v1633_v61, %v1405_v59 }
0x113d   :  { %v1296_v3 = vpop.f32.mrf.mxu1 }
0x113e   :  { %v1362_v4 = vmul.f32 %v1339_v60, %v1302_v62  ;;  %v1297_v7 = vadd.f32 %v1405_v59, %v1296_v3 }
0x113f   :  { %v1636_v56 = vpop.f32.mrf.mxu1 }
0x1140   :  { %1368 = vst [vmem:[%s2186_s15 + $0x8] sm:$0xff] %v1362_v4  ;;  %v1361_v8 = vmul.f32 %v1334_v1, %v1297_v7  ;;  %v1312_v11 = vadd.f32 %v1636_v56, %v1405_v59 }
0x1141   :  { %v1306_v14 = vpop.f32.mrf.mxu1 }
0x1142   :  { %1367 = vst [vmem:[%s2186_s15] sm:$0xff] %v1361_v8  ;;  %v1364_v15 = vmul.f32 %v1349_v13, %v1312_v11  ;;  %v1307_v16 = vadd.f32 %v1405_v59, %v1306_v14 }
0x1144   :  { %1370 = vst [vmem:[%s2186_s15 + $0x18] sm:$0xff] %v1364_v15  ;;  %v1363_v18 = vmul.f32 %v1344_v17, %v1307_v16 }
0x1146   :  { %1369 = vst [vmem:[%s2186_s15 + $0x10] sm:$0xff] %v1363_v18 }
0x11ae   :  { %v1639_v19 = vpop.f32.mrf.mxu1 }
0x11af   :  { %v1322_v20 = vadd.f32 %v1639_v19, %v1405_v59 }
0x11b0   :  { %v1316_v22 = vpop.f32.mrf.mxu1 }
0x11b1   :  { %v1366_v23 = vmul.f32 %v1359_v21, %v1322_v20  ;;  %v1317_v24 = vadd.f32 %v1405_v59, %v1316_v22 }
0x11b3   :  { %1372 = vst [vmem:[%s2186_s15 + $0x28] sm:$0xff] %v1366_v23  ;;  %v1365_v26 = vmul.f32 %v1354_v25, %v1317_v24 }
0x11b5   :  { %1371 = vst [vmem:[%s2186_s15 + $0x20] sm:$0xff] %v1365_v26 }

</bundles_post_ra>
